<compile_context>
chip_gen: v6e
topology: v6e:2x2x1
jax: 0.10.0
libtpu: 0.0.40
codegen_flags: <defaults>
</compile_context>

<pallas_src>
import math
import functools

import jax
import jax.numpy as jnp
from jax import lax
from jax.experimental import pallas as pl
from jax.experimental.pallas import tpu as pltpu

EPS = 1e-6       # LayerNorm eps (added to std, NOT var -- matches the torch module)
NEG_INF = -1e9


def _layer_norm(v, d, alpha, beta):
    f32 = jnp.float32
    mean = jnp.mean(v, axis=-1, keepdims=True)
    # torch.std() is the unbiased estimator (ddof = 1); eps added to std.
    var = jnp.sum((v - mean) ** 2, axis=-1, keepdims=True) * f32(1.0 / (d - 1))
    std = jnp.sqrt(var)
    return alpha * (v - mean) / (std + EPS) + beta


# --------------------- pass 1: LayerNorm + K/V (once per batch row) ---------------------
def kv_prepass_kernel(ln_ref,              # SMEM (4,): alpha1, beta1, alpha2, beta2
                      x_ref,               # (S, D) one batch row of x
                      wk_ref, bk_ref, wv_ref, bv_ref,
                      kt_ref,              # out (h, d_k, S) bf16  (K pre-transposed per head)
                      v_ref,               # out (h, S, d_k) bf16
                      *, h: int, d_k: int):
    f32, bf16 = jnp.float32, jnp.bfloat16
    x = x_ref[...].astype(f32)                        # (S, D)
    S, D = x.shape
    xn = _layer_norm(x, D, ln_ref[0], ln_ref[1])
    xn16 = xn.astype(bf16)
    k = jnp.dot(xn16, wk_ref[...], preferred_element_type=f32) + bk_ref[0]   # (S, D)
    v = jnp.dot(xn16, wv_ref[...], preferred_element_type=f32) + bv_ref[0]   # (S, D)
    k_t = k.T                                          # ONE (S,D)->(D,S) transpose per batch row
    for hd in range(h):                                # static; runs once per batch row
        sl = slice(hd * d_k, (hd + 1) * d_k)
        kt_ref[hd] = k_t[sl, :].astype(bf16)           # (d_k, S)
        v_ref[hd] = v[:, sl].astype(bf16)              # (S, d_k)


# --------------------- pass 2: attention + FFN (per batch row, query tile) ---------------------
def encoder_block_kernel(ln_ref,           # SMEM (4,)
                         xq_ref,            # (TQ, D) query-row tile of x
                         kt_ref,            # (h, d_k, S) bf16 (reused over query tiles)
                         v_ref,             # (h, S, d_k) bf16
                         bias_ref,          # (TQ, S) bf16 additive mask bias (0 / -1e9)
                         wq_ref, bq_ref,    # (h, D, d_k), (h, 1, d_k)
                         wo_ref, bo_ref,    # (D, D) or (h, d_k, D), (1, D)
                         w1_ref, b1_ref,    # (n_ffc, D, dffc), (n_ffc, 1, dffc)
                         w2_ref, b2_ref,    # (n_ffc, dffc, D), (1, D)
                         o_ref,             # (TQ, D)
                         *scratch,
                         h: int, d_k: int, n_ff_chunks: int, concat_heads: bool):
    f32, bf16 = jnp.float32, jnp.bfloat16
    xq = xq_ref[...].astype(f32)                       # (TQ, D)
    TQ, D = xq.shape
    alpha1, beta1, alpha2, beta2 = ln_ref[0], ln_ref[1], ln_ref[2], ln_ref[3]

    # ---- residual connection 0 : self-attention on LayerNorm(x) ----
    xn_q16 = _layer_norm(xq, D, alpha1, beta1).astype(bf16)
    bias = bias_ref[...].astype(f32)                   # (TQ, S)
    inv_sqrt_dk = f32(1.0 / math.sqrt(d_k))

    def head_ctx(hd):
        # per-head Q projection; 1/sqrt(d_k) folded into q (TQ*d_k muls, not TQ*S)
        qh = (jnp.dot(xn_q16, wq_ref[hd], preferred_element_type=f32)
              + bq_ref[hd]) * inv_sqrt_dk              # (TQ, d_k) f32
        # K arrives pre-transposed per head -> no per-tile transpose
        s = jnp.dot(qh.astype(bf16), kt_ref[hd],
                    preferred_element_type=f32) + bias  # (TQ, S)
        s = s - jnp.max(s, axis=-1, keepdims=True)
        p = jnp.exp(s)
        p = p * pl.reciprocal(jnp.sum(p, axis=-1, keepdims=True), approx=True)
        return jnp.dot(p.astype(bf16), v_ref[hd],
                       preferred_element_type=f32)      # (TQ, d_k)

    if concat_heads:
        # d_k multiple of 128: lane-aligned head concat + one K=D wo GEMM.
        ctx_ref = scratch[0]                            # (TQ, D) bf16 VMEM scratch
        def head_body(hd, carry):
            off = pl.multiple_of(hd * d_k, 128)
            ctx_ref[:, pl.ds(off, d_k)] = head_ctx(hd).astype(bf16)
            return carry
        lax.fori_loop(0, h, head_body, jnp.int32(0), unroll=True)
        attn = jnp.dot(ctx_ref[...], wo_ref[...], preferred_element_type=f32)
    else:
        # small d_k: accumulate each head straight into the D-wide output proj
        def head_body(hd, acc):
            return acc + jnp.dot(head_ctx(hd).astype(bf16), wo_ref[hd],
                                 preferred_element_type=f32)
        attn = lax.fori_loop(0, h, head_body, jnp.zeros((TQ, D), f32), unroll=True)
    attn = attn + bo_ref[0]

    # TODO(synk): nn.Dropout is identity in eval mode; training dropout not implemented.
    x1 = xq + attn

    # ---- residual connection 1 : feed-forward on LayerNorm(x1) ----
    xn2_16 = _layer_norm(x1, D, alpha2, beta2).astype(bf16)
    if n_ff_chunks == 1:
        hid = jnp.maximum(jnp.dot(xn2_16, w1_ref[0], preferred_element_type=f32)
                          + b1_ref[0], 0.0)
        ffn = jnp.dot(hid.astype(bf16), w2_ref[0], preferred_element_type=f32)
    else:
        # ReLU + 2nd FFN GEMM fused per d_ff chunk; (TQ, d_ff) never materializes.
        def ffn_body(c, acc):
            hid = jnp.maximum(jnp.dot(xn2_16, w1_ref[c], preferred_element_type=f32)
                              + b1_ref[c], 0.0)
            return acc + jnp.dot(hid.astype(bf16), w2_ref[c],
                                 preferred_element_type=f32)
        ffn = lax.fori_loop(0, n_ff_chunks, ffn_body, jnp.zeros((TQ, D), f32),
                            unroll=True)
    ffn = ffn + b2_ref[0]

    o_ref[...] = (x1 + ffn).astype(o_ref.dtype)


# ------------------------------------ wrapper ------------------------------------
def _pick_tile(total, candidates):
    for t in candidates:
        if total % t == 0:
            return t
    return total


def _vmem_ceiling():
    try:
        cap = int(pltpu.get_tpu_info().vmem_capacity_bytes)
    except Exception:
        cap = 64 * 1024 * 1024          # conservative fallback (v7x per-core VMEM)
    return int(0.85 * cap)              # ~108 MiB on v5e/v6e, ~54 MiB on v7x


def _clamp_vmem(estimate, ceiling):
    floor = min(32 * 1024 * 1024, ceiling)
    return int(max(min(int(estimate), ceiling), floor))


def encoder_block(x, mask, params, *, h, single_buffer_weights=True):
    B, S, D = x.shape
    d_ff = params["w1"].shape[1]
    assert D % h == 0
    d_k = D // h

    tq = S if S <= 256 else _pick_tile(S, (256, 128, 64, 32, 16, 8))
    dffc = d_ff if d_ff <= 1024 else _pick_tile(d_ff, (1024, 512, 256, 128))
    n_ffc = d_ff // dffc
    concat_heads = (d_k % 128 == 0)

    f32, bf16 = jnp.float32, jnp.bfloat16
    # Weight layouts: every in-kernel dynamic index lands on a *leading* dim.
    wqh = params["wq"].astype(bf16).reshape(D, h, d_k).transpose(1, 0, 2)       # (h, D, d_k)
    bqh = params["bq"].astype(f32).reshape(1, h, d_k).transpose(1, 0, 2)        # (h, 1, d_k)
    wk = params["wk"].astype(bf16)
    wv = params["wv"].astype(bf16)
    wo = (params["wo"].astype(bf16) if concat_heads
          else params["wo"].astype(bf16).reshape(h, d_k, D))
    # TODO(synk): for very large d_ff (v7x 64 MiB VMEM) stream w1/w2 chunks from HBM
    # via an extra grid axis instead of keeping them resident.
    w1c = params["w1"].astype(bf16).reshape(D, n_ffc, dffc).transpose(1, 0, 2)  # (n_ffc, D, dffc)
    b1c = params["b1"].astype(f32).reshape(1, n_ffc, dffc).transpose(1, 0, 2)   # (n_ffc, 1, dffc)
    w2c = params["w2"].astype(bf16).reshape(n_ffc, dffc, D)                     # (n_ffc, dffc, D)
    # Additive mask bias (0 keep / -1e9 masked) precomputed once, shipped bf16.
    bias = jnp.where(mask == 0, f32(NEG_INF), f32(0.0)).astype(bf16)

    def sb_spec(shape, index_map):
        kwargs = {}
        if single_buffer_weights:
            kwargs["pipeline_mode"] = pl.Buffered(1)
        return pl.BlockSpec(shape, index_map, **kwargs)

    def const_spec(shape):
        return sb_spec(shape, lambda *_: (0,) * len(shape))

    ceiling = _vmem_ceiling()
    itemsize = x.dtype.itemsize

    # ---------------- pass 1: K/V projections, once per batch row ----------------
    kv_w = 2 * D * D * 2 + (2 * D + 4) * 4
    if not single_buffer_weights:
        kv_w *= 2
    kv_est = kv_w + 2 * S * D * itemsize + 4 * S * D * 2 + 6 * S * D * 4
    kv_vmem = _clamp_vmem(2 * kv_est, ceiling)

    kt, v_heads = pl.pallas_call(
        functools.partial(kv_prepass_kernel, h=h, d_k=d_k),
        out_shape=(jax.ShapeDtypeStruct((B, h, d_k, S), bf16),
                   jax.ShapeDtypeStruct((B, h, S, d_k), bf16)),
        grid_spec=pltpu.PrefetchScalarGridSpec(
            num_scalar_prefetch=0,
            grid=(B,),
            in_specs=[
                pl.BlockSpec(memory_space=pltpu.MemorySpace.SMEM),   # ln params
                pl.BlockSpec((None, S, D), lambda b: (b, 0, 0)),     # x (one batch row)
                const_spec((D, D)), const_spec((1, D)),              # wk, bk
                const_spec((D, D)), const_spec((1, D)),              # wv, bv
            ],
            out_specs=(pl.BlockSpec((None, h, d_k, S), lambda b: (b, 0, 0, 0)),
                       pl.BlockSpec((None, h, S, d_k), lambda b: (b, 0, 0, 0))),
        ),
        compiler_params=pltpu.CompilerParams(
            dimension_semantics=("parallel",),
            vmem_limit_bytes=kv_vmem),
    )(params["ln"], x, wk, params["bk"], wv, params["bv"])

    # ---------------- pass 2: attention + FFN over (batch, query-tile) grid ----------------
    w_b = (2 * D * D + 2 * D * d_ff) * 2 + (3 * D + d_ff + 4) * 4
    if not single_buffer_weights:
        w_b *= 2
    kv_res = 2 * S * D * 2 * (1 if single_buffer_weights else 2)
    blk = 2 * (2 * tq * D * itemsize + tq * S * 2)
    tmp = (8 * tq * D + 4 * tq * S + 2 * tq * dffc) * 4 + tq * D * 2
    main_vmem = _clamp_vmem(2 * (w_b + kv_res + blk + tmp), ceiling)

    scratch_shapes = [pltpu.VMEM((tq, D), bf16)] if concat_heads else []
    kernel = functools.partial(encoder_block_kernel, h=h, d_k=d_k,
                               n_ff_chunks=n_ffc, concat_heads=concat_heads)

    return pl.pallas_call(
        kernel,
        out_shape=jax.ShapeDtypeStruct((B, S, D), x.dtype),
        grid_spec=pltpu.PrefetchScalarGridSpec(
            num_scalar_prefetch=0,
            grid=(B, S // tq),
            in_specs=[
                pl.BlockSpec(memory_space=pltpu.MemorySpace.SMEM),        # ln params
                pl.BlockSpec((None, tq, D), lambda b, qi: (b, qi, 0)),    # x query tile
                sb_spec((None, h, d_k, S), lambda b, qi: (b, 0, 0, 0)),   # K^T (reused over qi)
                sb_spec((None, h, S, d_k), lambda b, qi: (b, 0, 0, 0)),   # V   (reused over qi)
                pl.BlockSpec((None, tq, S), lambda b, qi: (b, qi, 0)),    # mask bias tile
                const_spec((h, D, d_k)), const_spec((h, 1, d_k)),         # wq, bq (per head)
                const_spec(wo.shape), const_spec((1, D)),                 # wo, bo
                const_spec((n_ffc, D, dffc)), const_spec((n_ffc, 1, dffc)),  # w1, b1
                const_spec((n_ffc, dffc, D)), const_spec((1, D)),         # w2, b2
            ],
            out_specs=pl.BlockSpec((None, tq, D), lambda b, qi: (b, qi, 0)),
            scratch_shapes=scratch_shapes,
        ),
        compiler_params=pltpu.CompilerParams(
            dimension_semantics=("parallel", "parallel"),
            vmem_limit_bytes=main_vmem),
    )(params["ln"], x, kt, v_heads, bias,
      wqh, bqh, wo, params["bo"],
      w1c, b1c, w2c, params["b2"])


# ----------------------- pure-JAX reference for validation -----------------------
def reference(x, mask, params, *, h):
    B, S, D = x.shape
    d_k = D // h

    def layer_norm(v, alpha, beta):
        mean = v.mean(-1, keepdims=True)
        std = jnp.sqrt(((v - mean) ** 2).sum(-1, keepdims=True) / (D - 1))
        return alpha * (v - mean) / (std + EPS) + beta

    ln = params["ln"]
    xn = layer_norm(x, ln[0], ln[1])
    q = xn @ params["wq"] + params["bq"][0]
    k = xn @ params["wk"] + params["bk"][0]
    v = xn @ params["wv"] + params["bv"][0]

    def split(t):  # (B,S,D) -> (B,h,S,d_k)
        return t.reshape(B, S, h, d_k).transpose(0, 2, 1, 3)

    qh, kh, vh = split(q), split(k), split(v)
    scores = jnp.einsum("bhqd,bhkd->bhqk", qh, kh) / math.sqrt(d_k)
    scores = jnp.where(mask[:, None, :, :] == 0, NEG_INF, scores)
    p = jax.nn.softmax(scores, axis=-1)
    ctx = jnp.einsum("bhqk,bhkd->bhqd", p, vh).transpose(0, 2, 1, 3).reshape(B, S, D)
    attn = ctx @ params["wo"] + params["bo"][0]
    x1 = x + attn

    xn2 = layer_norm(x1, ln[2], ln[3])
    ffn = jnp.maximum(xn2 @ params["w1"] + params["b1"][0], 0.0) @ params["w2"] + params["b2"][0]
    return x1 + ffn


if __name__ == "__main__":
    B, S, D, H, D_FF = 2, 8, 32, 4, 64

    key = jax.random.PRNGKey(0)
    ks = jax.random.split(key, 13)

    def init(k, shape, scale=0.05):
        return (scale * jax.random.normal(k, shape)).astype(jnp.float32)

    params = {
        # LayerNorm params (torch init alpha=1, beta=0) packed as
        # [alpha1, beta1, alpha2, beta2]
        "ln": jnp.array([1.0, 0.0, 1.0, 0.0], dtype=jnp.float32),
        "wq": init(ks[0], (D, D)), "bq": init(ks[1], (1, D)),
        "wk": init(ks[2], (D, D)), "bk": init(ks[3], (1, D)),
        "wv": init(ks[4], (D, D)), "bv": init(ks[5], (1, D)),
        "wo": init(ks[6], (D, D)), "bo": init(ks[7], (1, D)),
        "w1": init(ks[8], (D, D_FF)), "b1": init(ks[9], (1, D_FF)),
        "w2": init(ks[10], (D_FF, D)), "b2": init(ks[11], (1, D)),
    }

    x = jax.random.normal(ks[12], (B, S, D), dtype=jnp.float32)
    # causal mask (every row keeps at least one position)
    mask = jnp.broadcast_to(jnp.tril(jnp.ones((S, S), jnp.float32)), (B, S, S))

    try:
        out = jax.block_until_ready(encoder_block(x, mask, params, h=H))
    except Exception:
        # Fall back to default (double) buffering if this JAX build does not
        # support pipeline_mode on pallas_call BlockSpecs.
        out = jax.block_until_ready(
            encoder_block(x, mask, params, h=H, single_buffer_weights=False))

    ref = reference(x, mask, params, h=H)
    assert out.shape == (B, S, D)
    # bf16 MXU operands + bf16 K/V/bias storage (all with f32 accumulation) vs
    # the all-f32 reference -> slightly looser tolerance than pure f32.
    err = float(jnp.max(jnp.abs(out - ref)))
    assert jnp.allclose(out, ref, atol=5e-3, rtol=5e-3), err
    print("KERNEL_OK")
</pallas_src>

<mosaic_0001>
module attributes {stable_mosaic.version = 11 : i64} {
  func.func @kv_prepass_kernel(%arg0: i32, %arg1: memref<4xf32, #tpu.memory_space<smem>>, %arg2: memref<1x8x32xf32, #tpu.memory_space<vmem>>, %arg3: memref<32x32xbf16, #tpu.memory_space<vmem>>, %arg4: memref<1x32xf32, #tpu.memory_space<vmem>>, %arg5: memref<32x32xbf16, #tpu.memory_space<vmem>>, %arg6: memref<1x32xf32, #tpu.memory_space<vmem>>, %arg7: memref<1x4x8x8xbf16, #tpu.memory_space<vmem>>, %arg8: memref<1x4x8x8xbf16, #tpu.memory_space<vmem>>) attributes {dimension_semantics = [#tpu.dimension_semantics<parallel>], iteration_bounds = array<i64: 2>, scalar_prefetch = 0 : i64, scratch_operands = 0 : i64, tpu.core_type = #tpu.core_type<tc>, window_params = [{transform_indices = @transform_0, window_bounds = array<i64: 4>}, {transform_indices = @transform_1, window_bounds = array<i64: 1, 8, 32>}, {pipeline_mode = #tpu.pipeline_mode<synchronous>, transform_indices = @transform_2, window_bounds = array<i64: 32, 32>}, {pipeline_mode = #tpu.pipeline_mode<synchronous>, transform_indices = @transform_3, window_bounds = array<i64: 1, 32>}, {pipeline_mode = #tpu.pipeline_mode<synchronous>, transform_indices = @transform_4, window_bounds = array<i64: 32, 32>}, {pipeline_mode = #tpu.pipeline_mode<synchronous>, transform_indices = @transform_5, window_bounds = array<i64: 1, 32>}, {transform_indices = @transform_6, window_bounds = array<i64: 1, 4, 8, 8>}, {transform_indices = @transform_7, window_bounds = array<i64: 1, 4, 8, 8>}]} {
    %c0 = arith.constant 0 : index
    %c0_0 = arith.constant 0 : index
    %c0_1 = arith.constant 0 : index
    %0 = vector.load %arg2[%c0, %c0_0, %c0_1] : memref<1x8x32xf32, #tpu.memory_space<vmem>>, vector<1x8x32xf32>
    %1 = vector.shape_cast %0 : vector<1x8x32xf32> to vector<8x32xf32>
    %c0_2 = arith.constant 0 : index
    %2 = memref.load %arg1[%c0_2] : memref<4xf32, #tpu.memory_space<smem>>
    %c1 = arith.constant 1 : index
    %3 = memref.load %arg1[%c1] : memref<4xf32, #tpu.memory_space<smem>>
    %cst = arith.constant dense<0.000000e+00> : vector<8xf32>
    %4 = vector.multi_reduction <add>, %1, %cst [1] : vector<8x32xf32> to vector<8xf32>
    %5 = vector.shape_cast %4 : vector<8xf32> to vector<8x1xf32>
    %cst_3 = arith.constant 3.200000e+01 : f32
    %6 = vector.broadcast %cst_3 : f32 to vector<8x1xf32>
    %7 = arith.divf %5, %6 : vector<8x1xf32>
    %8 = vector.broadcast %7 : vector<8x1xf32> to vector<8x32xf32>
    %9 = arith.subf %1, %8 : vector<8x32xf32>
    %10 = arith.mulf %9, %9 : vector<8x32xf32>
    %cst_4 = arith.constant dense<0.000000e+00> : vector<8xf32>
    %11 = vector.multi_reduction <add>, %10, %cst_4 [1] : vector<8x32xf32> to vector<8xf32>
    %12 = vector.shape_cast %11 : vector<8xf32> to vector<8x1xf32>
    %cst_5 = arith.constant 0.0322580636 : f32
    %13 = vector.broadcast %cst_5 : f32 to vector<8x1xf32>
    %14 = arith.mulf %12, %13 : vector<8x1xf32>
    %15 = math.sqrt %14 : vector<8x1xf32>
    %16 = vector.broadcast %7 : vector<8x1xf32> to vector<8x32xf32>
    %17 = arith.subf %1, %16 : vector<8x32xf32>
    %18 = vector.broadcast %2 : f32 to vector<8x32xf32>
    %19 = arith.mulf %18, %17 : vector<8x32xf32>
    %cst_6 = arith.constant 9.99999997E-7 : f32
    %20 = vector.broadcast %cst_6 : f32 to vector<8x1xf32>
    %21 = arith.addf %15, %20 : vector<8x1xf32>
    %22 = vector.broadcast %21 : vector<8x1xf32> to vector<8x32xf32>
    %23 = arith.divf %19, %22 : vector<8x32xf32>
    %24 = vector.broadcast %3 : f32 to vector<8x32xf32>
    %25 = arith.addf %23, %24 : vector<8x32xf32>
    %26 = arith.truncf %25 : vector<8x32xf32> to vector<8x32xbf16>
    %c0_7 = arith.constant 0 : index
    %c0_8 = arith.constant 0 : index
    %27 = vector.load %arg3[%c0_7, %c0_8] : memref<32x32xbf16, #tpu.memory_space<vmem>>, vector<32x32xbf16>
    %cst_9 = arith.constant dense<0.000000e+00> : vector<8x32xf32>
    %28 = tpu.matmul %26, %27, %cst_9 {dimension_numbers = #tpu.dot_dimension_numbers<[1], [0], [0], [1], [0, 0, 1, 1], [], []>} : vector<8x32xbf16>, vector<32x32xbf16>, vector<8x32xf32> -> vector<8x32xf32>
    %c0_10 = arith.constant 0 : index
    %c0_11 = arith.constant 0 : index
    %29 = vector.load %arg4[%c0_10, %c0_11] : memref<1x32xf32, #tpu.memory_space<vmem>>, vector<1x32xf32>
    %30 = vector.shape_cast %29 : vector<1x32xf32> to vector<32xf32>
    %31 = vector.shape_cast %30 : vector<32xf32> to vector<1x32xf32>
    %32 = vector.broadcast %31 : vector<1x32xf32> to vector<8x32xf32>
    %33 = arith.addf %28, %32 : vector<8x32xf32>
    %c0_12 = arith.constant 0 : index
    %c0_13 = arith.constant 0 : index
    %34 = vector.load %arg5[%c0_12, %c0_13] : memref<32x32xbf16, #tpu.memory_space<vmem>>, vector<32x32xbf16>
    %cst_14 = arith.constant dense<0.000000e+00> : vector<8x32xf32>
    %35 = tpu.matmul %26, %34, %cst_14 {dimension_numbers = #tpu.dot_dimension_numbers<[1], [0], [0], [1], [0, 0, 1, 1], [], []>} : vector<8x32xbf16>, vector<32x32xbf16>, vector<8x32xf32> -> vector<8x32xf32>
    %c0_15 = arith.constant 0 : index
    %c0_16 = arith.constant 0 : index
    %36 = vector.load %arg6[%c0_15, %c0_16] : memref<1x32xf32, #tpu.memory_space<vmem>>, vector<1x32xf32>
    %37 = vector.shape_cast %36 : vector<1x32xf32> to vector<32xf32>
    %38 = vector.shape_cast %37 : vector<32xf32> to vector<1x32xf32>
    %39 = vector.broadcast %38 : vector<1x32xf32> to vector<8x32xf32>
    %40 = arith.addf %35, %39 : vector<8x32xf32>
    %41 = tpu.transpose %33, [1, 0] : vector<8x32xf32> -> vector<32x8xf32>
    %42 = vector.extract_strided_slice %41 {offsets = [0, 0], sizes = [8, 8], strides = [1, 1]} : vector<32x8xf32> to vector<8x8xf32>
    %43 = arith.truncf %42 : vector<8x8xf32> to vector<8x8xbf16>
    %c0_17 = arith.constant 0 : index
    %c0_18 = arith.constant 0 : index
    %c0_19 = arith.constant 0 : index
    %c0_20 = arith.constant 0 : index
    %44 = vector.load %arg7[%c0_17, %c0_18, %c0_19, %c0_20] : memref<1x4x8x8xbf16, #tpu.memory_space<vmem>>, vector<1x1x8x8xbf16>
    %45 = vector.shape_cast %44 : vector<1x1x8x8xbf16> to vector<8x8xbf16>
    %46 = vector.shape_cast %43 : vector<8x8xbf16> to vector<1x1x8x8xbf16>
    tpu.vector_store %arg7[%c0_17, %c0_18, %c0_19, %c0_20], %46 {strides = array<i32>} : memref<1x4x8x8xbf16, #tpu.memory_space<vmem>>, vector<1x1x8x8xbf16>,
    %47 = vector.extract_strided_slice %40 {offsets = [0, 0], sizes = [8, 8], strides = [1, 1]} : vector<8x32xf32> to vector<8x8xf32>
    %48 = arith.truncf %47 : vector<8x8xf32> to vector<8x8xbf16>
    %c0_21 = arith.constant 0 : index
    %c0_22 = arith.constant 0 : index
    %c0_23 = arith.constant 0 : index
    %c0_24 = arith.constant 0 : index
    %49 = vector.load %arg8[%c0_21, %c0_22, %c0_23, %c0_24] : memref<1x4x8x8xbf16, #tpu.memory_space<vmem>>, vector<1x1x8x8xbf16>
    %50 = vector.shape_cast %49 : vector<1x1x8x8xbf16> to vector<8x8xbf16>
    %51 = vector.shape_cast %48 : vector<8x8xbf16> to vector<1x1x8x8xbf16>
    tpu.vector_store %arg8[%c0_21, %c0_22, %c0_23, %c0_24], %51 {strides = array<i32>} : memref<1x4x8x8xbf16, #tpu.memory_space<vmem>>, vector<1x1x8x8xbf16>,
    %52 = vector.extract_strided_slice %41 {offsets = [8, 0], sizes = [8, 8], strides = [1, 1]} : vector<32x8xf32> to vector<8x8xf32>
    %53 = arith.truncf %52 : vector<8x8xf32> to vector<8x8xbf16>
    %c0_25 = arith.constant 0 : index
    %c1_26 = arith.constant 1 : index
    %c0_27 = arith.constant 0 : index
    %c0_28 = arith.constant 0 : index
    %54 = vector.load %arg7[%c0_25, %c1_26, %c0_27, %c0_28] : memref<1x4x8x8xbf16, #tpu.memory_space<vmem>>, vector<1x1x8x8xbf16>
    %55 = vector.shape_cast %54 : vector<1x1x8x8xbf16> to vector<8x8xbf16>
    %56 = vector.shape_cast %53 : vector<8x8xbf16> to vector<1x1x8x8xbf16>
    tpu.vector_store %arg7[%c0_25, %c1_26, %c0_27, %c0_28], %56 {strides = array<i32>} : memref<1x4x8x8xbf16, #tpu.memory_space<vmem>>, vector<1x1x8x8xbf16>,
    %57 = vector.extract_strided_slice %40 {offsets = [0, 8], sizes = [8, 8], strides = [1, 1]} : vector<8x32xf32> to vector<8x8xf32>
    %58 = arith.truncf %57 : vector<8x8xf32> to vector<8x8xbf16>
    %c0_29 = arith.constant 0 : index
    %c1_30 = arith.constant 1 : index
    %c0_31 = arith.constant 0 : index
    %c0_32 = arith.constant 0 : index
    %59 = vector.load %arg8[%c0_29, %c1_30, %c0_31, %c0_32] : memref<1x4x8x8xbf16, #tpu.memory_space<vmem>>, vector<1x1x8x8xbf16>
    %60 = vector.shape_cast %59 : vector<1x1x8x8xbf16> to vector<8x8xbf16>
    %61 = vector.shape_cast %58 : vector<8x8xbf16> to vector<1x1x8x8xbf16>
    tpu.vector_store %arg8[%c0_29, %c1_30, %c0_31, %c0_32], %61 {strides = array<i32>} : memref<1x4x8x8xbf16, #tpu.memory_space<vmem>>, vector<1x1x8x8xbf16>,
    %62 = vector.extract_strided_slice %41 {offsets = [16, 0], sizes = [8, 8], strides = [1, 1]} : vector<32x8xf32> to vector<8x8xf32>
    %63 = arith.truncf %62 : vector<8x8xf32> to vector<8x8xbf16>
    %c0_33 = arith.constant 0 : index
    %c2 = arith.constant 2 : index
    %c0_34 = arith.constant 0 : index
    %c0_35 = arith.constant 0 : index
    %64 = vector.load %arg7[%c0_33, %c2, %c0_34, %c0_35] : memref<1x4x8x8xbf16, #tpu.memory_space<vmem>>, vector<1x1x8x8xbf16>
    %65 = vector.shape_cast %64 : vector<1x1x8x8xbf16> to vector<8x8xbf16>
    %66 = vector.shape_cast %63 : vector<8x8xbf16> to vector<1x1x8x8xbf16>
    tpu.vector_store %arg7[%c0_33, %c2, %c0_34, %c0_35], %66 {strides = array<i32>} : memref<1x4x8x8xbf16, #tpu.memory_space<vmem>>, vector<1x1x8x8xbf16>,
    %67 = vector.extract_strided_slice %40 {offsets = [0, 16], sizes = [8, 8], strides = [1, 1]} : vector<8x32xf32> to vector<8x8xf32>
    %68 = arith.truncf %67 : vector<8x8xf32> to vector<8x8xbf16>
    %c0_36 = arith.constant 0 : index
    %c2_37 = arith.constant 2 : index
    %c0_38 = arith.constant 0 : index
    %c0_39 = arith.constant 0 : index
    %69 = vector.load %arg8[%c0_36, %c2_37, %c0_38, %c0_39] : memref<1x4x8x8xbf16, #tpu.memory_space<vmem>>, vector<1x1x8x8xbf16>
    %70 = vector.shape_cast %69 : vector<1x1x8x8xbf16> to vector<8x8xbf16>
    %71 = vector.shape_cast %68 : vector<8x8xbf16> to vector<1x1x8x8xbf16>
    tpu.vector_store %arg8[%c0_36, %c2_37, %c0_38, %c0_39], %71 {strides = array<i32>} : memref<1x4x8x8xbf16, #tpu.memory_space<vmem>>, vector<1x1x8x8xbf16>,
    %72 = vector.extract_strided_slice %41 {offsets = [24, 0], sizes = [8, 8], strides = [1, 1]} : vector<32x8xf32> to vector<8x8xf32>
    %73 = arith.truncf %72 : vector<8x8xf32> to vector<8x8xbf16>
    %c0_40 = arith.constant 0 : index
    %c3 = arith.constant 3 : index
    %c0_41 = arith.constant 0 : index
    %c0_42 = arith.constant 0 : index
    %74 = vector.load %arg7[%c0_40, %c3, %c0_41, %c0_42] : memref<1x4x8x8xbf16, #tpu.memory_space<vmem>>, vector<1x1x8x8xbf16>
    %75 = vector.shape_cast %74 : vector<1x1x8x8xbf16> to vector<8x8xbf16>
    %76 = vector.shape_cast %73 : vector<8x8xbf16> to vector<1x1x8x8xbf16>
    tpu.vector_store %arg7[%c0_40, %c3, %c0_41, %c0_42], %76 {strides = array<i32>} : memref<1x4x8x8xbf16, #tpu.memory_space<vmem>>, vector<1x1x8x8xbf16>,
    %77 = vector.extract_strided_slice %40 {offsets = [0, 24], sizes = [8, 8], strides = [1, 1]} : vector<8x32xf32> to vector<8x8xf32>
    %78 = arith.truncf %77 : vector<8x8xf32> to vector<8x8xbf16>
    %c0_43 = arith.constant 0 : index
    %c3_44 = arith.constant 3 : index
    %c0_45 = arith.constant 0 : index
    %c0_46 = arith.constant 0 : index
    %79 = vector.load %arg8[%c0_43, %c3_44, %c0_45, %c0_46] : memref<1x4x8x8xbf16, #tpu.memory_space<vmem>>, vector<1x1x8x8xbf16>
    %80 = vector.shape_cast %79 : vector<1x1x8x8xbf16> to vector<8x8xbf16>
    %81 = vector.shape_cast %78 : vector<8x8xbf16> to vector<1x1x8x8xbf16>
    tpu.vector_store %arg8[%c0_43, %c3_44, %c0_45, %c0_46], %81 {strides = array<i32>} : memref<1x4x8x8xbf16, #tpu.memory_space<vmem>>, vector<1x1x8x8xbf16>,
    return
  }
  func.func @transform_0(%arg0: i32) -> i32 {
    %c0_i32 = arith.constant 0 : i32
    %c0_i32_0 = arith.constant 0 : i32
    return %c0_i32 : i32
  }
  func.func @transform_1(%arg0: i32) -> (i32, i32, i32) {
    %c0_i32 = arith.constant 0 : i32
    %c0_i32_0 = arith.constant 0 : i32
    %c0_i32_1 = arith.constant 0 : i32
    return %arg0, %c0_i32, %c0_i32_0 : i32, i32, i32
  }
  func.func @transform_2(%arg0: i32) -> (i32, i32) {
    %c0_i32 = arith.constant 0 : i32
    %c0_i32_0 = arith.constant 0 : i32
    %c0_i32_1 = arith.constant 0 : i32
    return %c0_i32, %c0_i32_0 : i32, i32
  }
  func.func @transform_3(%arg0: i32) -> (i32, i32) {
    %c0_i32 = arith.constant 0 : i32
    %c0_i32_0 = arith.constant 0 : i32
    %c0_i32_1 = arith.constant 0 : i32
    return %c0_i32, %c0_i32_0 : i32, i32
  }
  func.func @transform_4(%arg0: i32) -> (i32, i32) {
    %c0_i32 = arith.constant 0 : i32
    %c0_i32_0 = arith.constant 0 : i32
    %c0_i32_1 = arith.constant 0 : i32
    return %c0_i32, %c0_i32_0 : i32, i32
  }
  func.func @transform_5(%arg0: i32) -> (i32, i32) {
    %c0_i32 = arith.constant 0 : i32
    %c0_i32_0 = arith.constant 0 : i32
    %c0_i32_1 = arith.constant 0 : i32
    return %c0_i32, %c0_i32_0 : i32, i32
  }
  func.func @transform_6(%arg0: i32) -> (i32, i32, i32, i32) {
    %c0_i32 = arith.constant 0 : i32
    %c0_i32_0 = arith.constant 0 : i32
    %c0_i32_1 = arith.constant 0 : i32
    %c0_i32_2 = arith.constant 0 : i32
    return %arg0, %c0_i32, %c0_i32_0, %c0_i32_1 : i32, i32, i32, i32
  }
  func.func @transform_7(%arg0: i32) -> (i32, i32, i32, i32) {
    %c0_i32 = arith.constant 0 : i32
    %c0_i32_0 = arith.constant 0 : i32
    %c0_i32_1 = arith.constant 0 : i32
    %c0_i32_2 = arith.constant 0 : i32
    return %arg0, %c0_i32, %c0_i32_0, %c0_i32_1 : i32, i32, i32, i32
  }
}

module attributes {stable_mosaic.version = 11 : i64} {
  func.func @kv_prepass_kernel(%arg0: i32, %arg1: memref<4xf32, #tpu.memory_space<smem>>, %arg2: memref<1x8x32xf32, #tpu.memory_space<vmem>>, %arg3: memref<32x32xbf16, #tpu.memory_space<vmem>>, %arg4: memref<1x32xf32, #tpu.memory_space<vmem>>, %arg5: memref<32x32xbf16, #tpu.memory_space<vmem>>, %arg6: memref<1x32xf32, #tpu.memory_space<vmem>>, %arg7: memref<1x4x8x8xbf16, #tpu.memory_space<vmem>>, %arg8: memref<1x4x8x8xbf16, #tpu.memory_space<vmem>>) attributes {dimension_semantics = [#tpu.dimension_semantics<parallel>], iteration_bounds = array<i64: 2>, scalar_prefetch = 0 : i64, scratch_operands = 0 : i64, tpu.core_type = #tpu.core_type<tc>, window_params = [{transform_indices = @transform_0, window_bounds = array<i64: 4>}, {transform_indices = @transform_1, window_bounds = array<i64: 1, 8, 32>}, {pipeline_mode = #tpu.pipeline_mode<synchronous>, transform_indices = @transform_2, window_bounds = array<i64: 32, 32>}, {pipeline_mode = #tpu.pipeline_mode<synchronous>, transform_indices = @transform_3, window_bounds = array<i64: 1, 32>}, {pipeline_mode = #tpu.pipeline_mode<synchronous>, transform_indices = @transform_4, window_bounds = array<i64: 32, 32>}, {pipeline_mode = #tpu.pipeline_mode<synchronous>, transform_indices = @transform_5, window_bounds = array<i64: 1, 32>}, {transform_indices = @transform_6, window_bounds = array<i64: 1, 4, 8, 8>}, {transform_indices = @transform_7, window_bounds = array<i64: 1, 4, 8, 8>}]} {
    %c0 = arith.constant 0 : index
    %c0_0 = arith.constant 0 : index
    %c0_1 = arith.constant 0 : index
    %0 = vector.load %arg2[%c0, %c0_0, %c0_1] : memref<1x8x32xf32, #tpu.memory_space<vmem>>, vector<1x8x32xf32>
    %1 = vector.shape_cast %0 : vector<1x8x32xf32> to vector<8x32xf32>
    %c0_2 = arith.constant 0 : index
    %2 = memref.load %arg1[%c0_2] : memref<4xf32, #tpu.memory_space<smem>>
    %c1 = arith.constant 1 : index
    %3 = memref.load %arg1[%c1] : memref<4xf32, #tpu.memory_space<smem>>
    %cst = arith.constant dense<0.000000e+00> : vector<8xf32>
    %4 = vector.multi_reduction <add>, %1, %cst [1] : vector<8x32xf32> to vector<8xf32>
    %5 = vector.shape_cast %4 : vector<8xf32> to vector<8x1xf32>
    %cst_3 = arith.constant 3.200000e+01 : f32
    %6 = vector.broadcast %cst_3 : f32 to vector<8x1xf32>
    %7 = arith.divf %5, %6 : vector<8x1xf32>
    %8 = vector.broadcast %7 : vector<8x1xf32> to vector<8x32xf32>
    %9 = arith.subf %1, %8 : vector<8x32xf32>
    %10 = arith.mulf %9, %9 : vector<8x32xf32>
    %cst_4 = arith.constant dense<0.000000e+00> : vector<8xf32>
    %11 = vector.multi_reduction <add>, %10, %cst_4 [1] : vector<8x32xf32> to vector<8xf32>
    %12 = vector.shape_cast %11 : vector<8xf32> to vector<8x1xf32>
    %cst_5 = arith.constant 0.0322580636 : f32
    %13 = vector.broadcast %cst_5 : f32 to vector<8x1xf32>
    %14 = arith.mulf %12, %13 : vector<8x1xf32>
    %15 = math.sqrt %14 : vector<8x1xf32>
    %16 = vector.broadcast %7 : vector<8x1xf32> to vector<8x32xf32>
    %17 = arith.subf %1, %16 : vector<8x32xf32>
    %18 = vector.broadcast %2 : f32 to vector<8x32xf32>
    %19 = arith.mulf %18, %17 : vector<8x32xf32>
    %cst_6 = arith.constant 9.99999997E-7 : f32
    %20 = vector.broadcast %cst_6 : f32 to vector<8x1xf32>
    %21 = arith.addf %15, %20 : vector<8x1xf32>
    %22 = vector.broadcast %21 : vector<8x1xf32> to vector<8x32xf32>
    %23 = arith.divf %19, %22 : vector<8x32xf32>
    %24 = vector.broadcast %3 : f32 to vector<8x32xf32>
    %25 = arith.addf %23, %24 : vector<8x32xf32>
    %26 = arith.truncf %25 : vector<8x32xf32> to vector<8x32xbf16>
    %c0_7 = arith.constant 0 : index
    %c0_8 = arith.constant 0 : index
    %27 = vector.load %arg3[%c0_7, %c0_8] : memref<32x32xbf16, #tpu.memory_space<vmem>>, vector<32x32xbf16>
    %cst_9 = arith.constant dense<0.000000e+00> : vector<8x32xf32>
    %28 = tpu.matmul %26, %27, %cst_9 {dimension_numbers = #tpu.dot_dimension_numbers<[1], [0], [0], [1], [0, 0, 1, 1], [], []>} : vector<8x32xbf16>, vector<32x32xbf16>, vector<8x32xf32> -> vector<8x32xf32>
    %c0_10 = arith.constant 0 : index
    %c0_11 = arith.constant 0 : index
    %29 = vector.load %arg4[%c0_10, %c0_11] : memref<1x32xf32, #tpu.memory_space<vmem>>, vector<1x32xf32>
    %30 = vector.shape_cast %29 : vector<1x32xf32> to vector<32xf32>
    %31 = vector.shape_cast %30 : vector<32xf32> to vector<1x32xf32>
    %32 = vector.broadcast %31 : vector<1x32xf32> to vector<8x32xf32>
    %33 = arith.addf %28, %32 : vector<8x32xf32>
    %c0_12 = arith.constant 0 : index
    %c0_13 = arith.constant 0 : index
    %34 = vector.load %arg5[%c0_12, %c0_13] : memref<32x32xbf16, #tpu.memory_space<vmem>>, vector<32x32xbf16>
    %cst_14 = arith.constant dense<0.000000e+00> : vector<8x32xf32>
    %35 = tpu.matmul %26, %34, %cst_14 {dimension_numbers = #tpu.dot_dimension_numbers<[1], [0], [0], [1], [0, 0, 1, 1], [], []>} : vector<8x32xbf16>, vector<32x32xbf16>, vector<8x32xf32> -> vector<8x32xf32>
    %c0_15 = arith.constant 0 : index
    %c0_16 = arith.constant 0 : index
    %36 = vector.load %arg6[%c0_15, %c0_16] : memref<1x32xf32, #tpu.memory_space<vmem>>, vector<1x32xf32>
    %37 = vector.shape_cast %36 : vector<1x32xf32> to vector<32xf32>
    %38 = vector.shape_cast %37 : vector<32xf32> to vector<1x32xf32>
    %39 = vector.broadcast %38 : vector<1x32xf32> to vector<8x32xf32>
    %40 = arith.addf %35, %39 : vector<8x32xf32>
    %41 = tpu.transpose %33, [1, 0] : vector<8x32xf32> -> vector<32x8xf32>
    %42 = vector.extract_strided_slice %41 {offsets = [0, 0], sizes = [8, 8], strides = [1, 1]} : vector<32x8xf32> to vector<8x8xf32>
    %43 = arith.truncf %42 : vector<8x8xf32> to vector<8x8xbf16>
    %c0_17 = arith.constant 0 : index
    %c0_18 = arith.constant 0 : index
    %c0_19 = arith.constant 0 : index
    %c0_20 = arith.constant 0 : index
    %44 = vector.load %arg7[%c0_17, %c0_18, %c0_19, %c0_20] : memref<1x4x8x8xbf16, #tpu.memory_space<vmem>>, vector<1x1x8x8xbf16>
    %45 = vector.shape_cast %44 : vector<1x1x8x8xbf16> to vector<8x8xbf16>
    %46 = vector.shape_cast %43 : vector<8x8xbf16> to vector<1x1x8x8xbf16>
    tpu.vector_store %arg7[%c0_17, %c0_18, %c0_19, %c0_20], %46 {strides = array<i32>} : memref<1x4x8x8xbf16, #tpu.memory_space<vmem>>, vector<1x1x8x8xbf16>,
    %47 = vector.extract_strided_slice %40 {offsets = [0, 0], sizes = [8, 8], strides = [1, 1]} : vector<8x32xf32> to vector<8x8xf32>
    %48 = arith.truncf %47 : vector<8x8xf32> to vector<8x8xbf16>
    %c0_21 = arith.constant 0 : index
    %c0_22 = arith.constant 0 : index
    %c0_23 = arith.constant 0 : index
    %c0_24 = arith.constant 0 : index
    %49 = vector.load %arg8[%c0_21, %c0_22, %c0_23, %c0_24] : memref<1x4x8x8xbf16, #tpu.memory_space<vmem>>, vector<1x1x8x8xbf16>
    %50 = vector.shape_cast %49 : vector<1x1x8x8xbf16> to vector<8x8xbf16>
    %51 = vector.shape_cast %48 : vector<8x8xbf16> to vector<1x1x8x8xbf16>
    tpu.vector_store %arg8[%c0_21, %c0_22, %c0_23, %c0_24], %51 {strides = array<i32>} : memref<1x4x8x8xbf16, #tpu.memory_space<vmem>>, vector<1x1x8x8xbf16>,
    %52 = vector.extract_strided_slice %41 {offsets = [8, 0], sizes = [8, 8], strides = [1, 1]} : vector<32x8xf32> to vector<8x8xf32>
    %53 = arith.truncf %52 : vector<8x8xf32> to vector<8x8xbf16>
    %c0_25 = arith.constant 0 : index
    %c1_26 = arith.constant 1 : index
    %c0_27 = arith.constant 0 : index
    %c0_28 = arith.constant 0 : index
    %54 = vector.load %arg7[%c0_25, %c1_26, %c0_27, %c0_28] : memref<1x4x8x8xbf16, #tpu.memory_space<vmem>>, vector<1x1x8x8xbf16>
    %55 = vector.shape_cast %54 : vector<1x1x8x8xbf16> to vector<8x8xbf16>
    %56 = vector.shape_cast %53 : vector<8x8xbf16> to vector<1x1x8x8xbf16>
    tpu.vector_store %arg7[%c0_25, %c1_26, %c0_27, %c0_28], %56 {strides = array<i32>} : memref<1x4x8x8xbf16, #tpu.memory_space<vmem>>, vector<1x1x8x8xbf16>,
    %57 = vector.extract_strided_slice %40 {offsets = [0, 8], sizes = [8, 8], strides = [1, 1]} : vector<8x32xf32> to vector<8x8xf32>
    %58 = arith.truncf %57 : vector<8x8xf32> to vector<8x8xbf16>
    %c0_29 = arith.constant 0 : index
    %c1_30 = arith.constant 1 : index
    %c0_31 = arith.constant 0 : index
    %c0_32 = arith.constant 0 : index
    %59 = vector.load %arg8[%c0_29, %c1_30, %c0_31, %c0_32] : memref<1x4x8x8xbf16, #tpu.memory_space<vmem>>, vector<1x1x8x8xbf16>
    %60 = vector.shape_cast %59 : vector<1x1x8x8xbf16> to vector<8x8xbf16>
    %61 = vector.shape_cast %58 : vector<8x8xbf16> to vector<1x1x8x8xbf16>
    tpu.vector_store %arg8[%c0_29, %c1_30, %c0_31, %c0_32], %61 {strides = array<i32>} : memref<1x4x8x8xbf16, #tpu.memory_space<vmem>>, vector<1x1x8x8xbf16>,
    %62 = vector.extract_strided_slice %41 {offsets = [16, 0], sizes = [8, 8], strides = [1, 1]} : vector<32x8xf32> to vector<8x8xf32>
    %63 = arith.truncf %62 : vector<8x8xf32> to vector<8x8xbf16>
    %c0_33 = arith.constant 0 : index
    %c2 = arith.constant 2 : index
    %c0_34 = arith.constant 0 : index
    %c0_35 = arith.constant 0 : index
    %64 = vector.load %arg7[%c0_33, %c2, %c0_34, %c0_35] : memref<1x4x8x8xbf16, #tpu.memory_space<vmem>>, vector<1x1x8x8xbf16>
    %65 = vector.shape_cast %64 : vector<1x1x8x8xbf16> to vector<8x8xbf16>
    %66 = vector.shape_cast %63 : vector<8x8xbf16> to vector<1x1x8x8xbf16>
    tpu.vector_store %arg7[%c0_33, %c2, %c0_34, %c0_35], %66 {strides = array<i32>} : memref<1x4x8x8xbf16, #tpu.memory_space<vmem>>, vector<1x1x8x8xbf16>,
    %67 = vector.extract_strided_slice %40 {offsets = [0, 16], sizes = [8, 8], strides = [1, 1]} : vector<8x32xf32> to vector<8x8xf32>
    %68 = arith.truncf %67 : vector<8x8xf32> to vector<8x8xbf16>
    %c0_36 = arith.constant 0 : index
    %c2_37 = arith.constant 2 : index
    %c0_38 = arith.constant 0 : index
    %c0_39 = arith.constant 0 : index
    %69 = vector.load %arg8[%c0_36, %c2_37, %c0_38, %c0_39] : memref<1x4x8x8xbf16, #tpu.memory_space<vmem>>, vector<1x1x8x8xbf16>
    %70 = vector.shape_cast %69 : vector<1x1x8x8xbf16> to vector<8x8xbf16>
    %71 = vector.shape_cast %68 : vector<8x8xbf16> to vector<1x1x8x8xbf16>
    tpu.vector_store %arg8[%c0_36, %c2_37, %c0_38, %c0_39], %71 {strides = array<i32>} : memref<1x4x8x8xbf16, #tpu.memory_space<vmem>>, vector<1x1x8x8xbf16>,
    %72 = vector.extract_strided_slice %41 {offsets = [24, 0], sizes = [8, 8], strides = [1, 1]} : vector<32x8xf32> to vector<8x8xf32>
    %73 = arith.truncf %72 : vector<8x8xf32> to vector<8x8xbf16>
    %c0_40 = arith.constant 0 : index
    %c3 = arith.constant 3 : index
    %c0_41 = arith.constant 0 : index
    %c0_42 = arith.constant 0 : index
    %74 = vector.load %arg7[%c0_40, %c3, %c0_41, %c0_42] : memref<1x4x8x8xbf16, #tpu.memory_space<vmem>>, vector<1x1x8x8xbf16>
    %75 = vector.shape_cast %74 : vector<1x1x8x8xbf16> to vector<8x8xbf16>
    %76 = vector.shape_cast %73 : vector<8x8xbf16> to vector<1x1x8x8xbf16>
    tpu.vector_store %arg7[%c0_40, %c3, %c0_41, %c0_42], %76 {strides = array<i32>} : memref<1x4x8x8xbf16, #tpu.memory_space<vmem>>, vector<1x1x8x8xbf16>,
    %77 = vector.extract_strided_slice %40 {offsets = [0, 24], sizes = [8, 8], strides = [1, 1]} : vector<8x32xf32> to vector<8x8xf32>
    %78 = arith.truncf %77 : vector<8x8xf32> to vector<8x8xbf16>
    %c0_43 = arith.constant 0 : index
    %c3_44 = arith.constant 3 : index
    %c0_45 = arith.constant 0 : index
    %c0_46 = arith.constant 0 : index
    %79 = vector.load %arg8[%c0_43, %c3_44, %c0_45, %c0_46] : memref<1x4x8x8xbf16, #tpu.memory_space<vmem>>, vector<1x1x8x8xbf16>
    %80 = vector.shape_cast %79 : vector<1x1x8x8xbf16> to vector<8x8xbf16>
    %81 = vector.shape_cast %78 : vector<8x8xbf16> to vector<1x1x8x8xbf16>
    tpu.vector_store %arg8[%c0_43, %c3_44, %c0_45, %c0_46], %81 {strides = array<i32>} : memref<1x4x8x8xbf16, #tpu.memory_space<vmem>>, vector<1x1x8x8xbf16>,
    return
  }
  func.func @transform_0(%arg0: i32) -> i32 {
    %c0_i32 = arith.constant 0 : i32
    %c0_i32_0 = arith.constant 0 : i32
    return %c0_i32 : i32
  }
  func.func @transform_1(%arg0: i32) -> (i32, i32, i32) {
    %c0_i32 = arith.constant 0 : i32
    %c0_i32_0 = arith.constant 0 : i32
    %c0_i32_1 = arith.constant 0 : i32
    return %arg0, %c0_i32, %c0_i32_0 : i32, i32, i32
  }
  func.func @transform_2(%arg0: i32) -> (i32, i32) {
    %c0_i32 = arith.constant 0 : i32
    %c0_i32_0 = arith.constant 0 : i32
    %c0_i32_1 = arith.constant 0 : i32
    return %c0_i32, %c0_i32_0 : i32, i32
  }
  func.func @transform_3(%arg0: i32) -> (i32, i32) {
    %c0_i32 = arith.constant 0 : i32
    %c0_i32_0 = arith.constant 0 : i32
    %c0_i32_1 = arith.constant 0 : i32
    return %c0_i32, %c0_i32_0 : i32, i32
  }
  func.func @transform_4(%arg0: i32) -> (i32, i32) {
    %c0_i32 = arith.constant 0 : i32
    %c0_i32_0 = arith.constant 0 : i32
    %c0_i32_1 = arith.constant 0 : i32
    return %c0_i32, %c0_i32_0 : i32, i32
  }
  func.func @transform_5(%arg0: i32) -> (i32, i32) {
    %c0_i32 = arith.constant 0 : i32
    %c0_i32_0 = arith.constant 0 : i32
    %c0_i32_1 = arith.constant 0 : i32
    return %c0_i32, %c0_i32_0 : i32, i32
  }
  func.func @transform_6(%arg0: i32) -> (i32, i32, i32, i32) {
    %c0_i32 = arith.constant 0 : i32
    %c0_i32_0 = arith.constant 0 : i32
    %c0_i32_1 = arith.constant 0 : i32
    %c0_i32_2 = arith.constant 0 : i32
    return %arg0, %c0_i32, %c0_i32_0, %c0_i32_1 : i32, i32, i32, i32
  }
  func.func @transform_7(%arg0: i32) -> (i32, i32, i32, i32) {
    %c0_i32 = arith.constant 0 : i32
    %c0_i32_0 = arith.constant 0 : i32
    %c0_i32_1 = arith.constant 0 : i32
    %c0_i32_2 = arith.constant 0 : i32
    return %arg0, %c0_i32, %c0_i32_0, %c0_i32_1 : i32, i32, i32, i32
  }
}

</mosaic_0001>

<bundles_post_ra>
// kernel: tpu_custom_call.1
= control target key start
LH: loop header
LB: loop body
LE: loop exit
PB: predicated region body
PF: predicated region fallthrough
CT: control target
= control target key end

     0   :  { %s1403_s0 = inlined_call_operand.hbm [shape: f32[4], index: 0, kind: input, shape index: {}]   ;;  %s1404_s1 = inlined_call_operand.hbm [shape: f32[2,8,32], index: 1, kind: input, shape index: {}]   ;;  %s1405_s2 = inlined_call_operand.hbm [shape: bf16[32,32], index: 2, kind: input, shape index: {}]   ;;  %s1406_s3 = inlined_call_operand.vmem [shape: f32[1,32], index: 3, kind: input, shape index: {}]   ;;  %s1407_s4 = inlined_call_operand.hbm [shape: bf16[32,32], index: 4, kind: input, shape index: {}]   ;;  %s1408_s5 = inlined_call_operand.vmem [shape: f32[1,32], index: 5, kind: input, shape index: {}]   ;;  %s1409_s6 = inlined_call_operand.hbm [shape: bf16[2,4,8,8], index: 6, kind: output, shape index: {0}]   ;;  %s1410_s7 = inlined_call_operand.hbm [shape: bf16[2,4,8,8], index: 7, kind: output, shape index: {1}]  }
   0x1   :  { %1415 = sst [smem:[#allocation18_spill]] %s1403_s0 }
   0x2   :  { %1416 = sst [smem:[#allocation19_spill]] %s1405_s2 }
   0x3   :  { %13 = vsyncpa [#allocation5], 0 }
   0x4   :  { %14 = vsyncpa [#allocation3], 0 }
   0x5   :  { %16 = vsyncpa [#allocation3 + $0x1], 0 }
   0x6   :  { %17 = vsyncpa [#allocation8], 0 }
   0x7   :  { %18 = vsyncpa [#allocation4], 0 }
   0x8   :  { %20 = vsyncpa [#allocation4 + $0x1], 0 }
   0x9   :  { %21 = vsyncpa [#allocation12], 0 }
   0xa   :  { %23 = vsyncpa [#allocation12 + $0x1], 0  ;;  %s1154_s24 = smov 0   ;;  %s1156_s25 = smov 0  }
   0xb   :  { %s1158_s26 = smov 0   ;;  %s1160_s27 = smov 0  }
   0xc LB: > { %s1175_s28 = sadd.s32 4294967295, %s1097_s27   ;;  %s741_s29 = sadd.s32 4294967294, %s1097_s27   ;;  %s1097_s27 = sphi %s1160_s27, %s1437_s27   ;;  %s1093_s26 = sphi %s1158_s26, %s1436_s26   ;;  %s1089_s25 = sphi %s1156_s25, %s1435_s25   ;;  %s1085_s24 = sphi %s1154_s24, %s1434_s24  }
   0xd   : > { %p70_p0 = scmp.ne.s32.totalorder %s1089_s25, %s1085_s24  ;;  %p1411_p1 = scmp.eq.s32.totalorder %s1175_s28, 0 }
   0xe   : > { %p178_p2 = scmp.eq.s32.totalorder %s1175_s28, 1  ;;  %p184_p3 = scmp.eq.s32.totalorder %s741_s29, 1 }
   0xf   : > { %p1184_p4 = por %p1411_p1, %p70_p0  ;;  %p742_p5 = scmp.ge.s32.totalorder %s1097_s27, 1 }
  0x10   : > { %p1189_p6 = por %p184_p3, %p70_p0  ;;  %p217_p7 = scmp.lt.s32.totalorder %s1097_s27, 3 }
  0x11   : > { %s1417_s30 = scalar_select %p1184_p4, 1, 0 }
  0x12   : > { %s1418_s8 = scalar_select %p1189_p6, 1, 0 }
  0x13   : > { %p1194_p8 = pnand %p742_p5, %p217_p7  ;;  %s1099_s10 = smov [#allocation7]  }
  0x14   : > { %s238_s11 = sshll.u32 %s1099_s10, 4  ;;  %s1100_s13 = smov [#allocation9]   ;;  %s239_s11 = int_to_ptr.vmem [resolvable:$true] %s238_s11 }
  0x15   : > { %s1419_s9 = scalar_select %p1194_p8, 1, 0 }
  0x16   : > { %p823_p9 = pneg %p1194_p8  ;;  %s254_s14 = sshll.u32 %s1100_s13, 4  ;;  %s255_s14 = int_to_ptr.vmem [resolvable:$true] %s254_s14 }
  0x17   : > { %s915_s15 = scalar_lea.vmem %s239_s11, 256  ;;  %p923_p5 = scmp.lt.s32.totalorder %s239_s11, %s239_s11 }
  0x18   : > { %p1203_p11 = pnand %p823_p9, %p1411_p1  ;;  %p916_p13 = scmp.ne.s32.totalorder %s239_s11, %s915_s15 }
  0x19   : > { %p924_p7 = scmp.lt.s32.totalorder %s915_s15, %s915_s15 }
  0x1a   : > { %p906_p12 = pneg %p1203_p11 }
  0x1b   : > { %p925_p10 = por %p924_p7, %p923_p5 }
  0x1c   : > { %p918_p0 = pnand %p916_p13, %p906_p12 }
  0x1e   : > { %p919_p3 = pneg %p918_p0 }
  0x20   : > { %p926_p9 = pnand %p925_p10, %p919_p3 }
  0x22   : > { %929 = shalt.err (!%p926_p9)
}
  0x23   : > { %s1101_s16 = smov 64   ;;  %s1102_s17 = smov 4  }
  0x24   : > { %s1421_s2 = sld [smem:[#allocation19_spill]]  ;;  %s1103_s20 = smov [#allocation2]  }
  0x25   : > { %s1422_s0 = sld [smem:[#allocation18_spill]]  ;;  %s952_s23 = scalar_lea.vmem %s255_s14, 256 }
  0x26   : > { %p953_p13 = scmp.ne.s32.totalorder %s255_s14, %s952_s23  ;;  %p960_p3 = scmp.lt.s32.totalorder %s255_s14, %s255_s14 }
  0x27   : > { %p961_p5 = scmp.lt.s32.totalorder %s952_s23, %s952_s23 }
  0x28   : > { %p955_p10 = pnand %p953_p13, %p906_p12 }
  0x29   : > { %p962_p7 = por %p961_p5, %p960_p3 }
  0x2a   : > { %829 = dma.hbm_to_vmem [thread:$0]  (!%p1203_p11), %s1421_s2, 256, %s239_s11, [#allocation8], %s1101_s16, %s1101_s16, %s1102_s17  }
  0x2b   : > { %826 = dma.hbm_to_smem (!%p1203_p11), %s1422_s0, 16, %s1103_s20, [#allocation5]  }
  0x2c   : > { %p956_p0 = pneg %p955_p10 }
  0x2e   : > { %p963_p9 = pnand %p962_p7, %p956_p0 }
  0x30   : > { %966 = shalt.err (!%p963_p9)
}
  0x31   : > { %832 = dma.hbm_to_vmem [thread:$0]  (!%p1203_p11), %s1407_s4, 256, %s255_s14, [#allocation8], %s1101_s16, %s1101_s16, %s1102_s17  }
  0x32   : > { %s1231_s11 = sadd.s32 1, %s1097_s27   ;;  %s57_s12 = sadd.s32 1, %s1093_s26 }
  0x33   : > { %s54_s13 = ssub.s32 %s1097_s27, %s1231_s11  ;;  %p64_p13 = scmp.ne.s32.totalorder %s1093_s26, %s1089_s25 }
  0x34   : > { %p55_p12 = scmp.eq.s32.totalorder %s54_s13, 0  ;;  %p65_p10 = scmp.eq.s32.totalorder %s1097_s27, 0 }
  0x35   : > { %p847_p0 = scmp.lt.s32.totalorder %s1097_s27, 2  ;;  %p1245_p5 = por %p178_p2, %p64_p13 }
  0x36   : > { %s1241_s15 = scalar_select %p55_p12, %s1093_s26, %s57_s12  }
  0x37   : > { %p66_p3 = por %p65_p10, %p64_p13  ;;  %s271_s19 = sand.u32 1, %s1093_s26  }
  0x38   : > { %s1423_s18 = scalar_select %p1245_p5, 1, 0 }
  0x39   : > { %s748_s20 = sshll.u32 %s1097_s27, 7  ;;  %s747_s14 = sshll.u32 %s271_s19, 3 }
  0x3a   : > { %s1254_s21 = scalar_lea.hbm %s1404_s1, %s748_s20  ;;  %s275_s22 = scalar_lea.vmem [#allocation6], %s747_s14 }
  0x3b   : > { %s282_s23 = sshll.u32 %s275_s22, 4  ;;  %p1256_p11 = pnand %p847_p0, %p66_p3  ;;  %s283_s23 = int_to_ptr.vmem [resolvable:$true] %s282_s23 }
  0x3c   : > { %s272_s10 = scalar_lea.sflag [#allocation3], %s271_s19  ;;  %s967_s13 = scalar_lea.hbm %s1254_s21, 128 }
  0x3d   : > { %p968_p2 = scmp.ne.s32.totalorder %s1254_s21, %s967_s13  ;;  %p969_p7 = pneg %p1256_p11 }
  0x3e   : > { %s972_s16 = scalar_lea.hbm %s1404_s1, 256  ;;  %p973_p13 = scmp.lt.s32.totalorder %s1254_s21, %s1404_s1 }
  0x3f   : > { %p970_p9 = pnand %p969_p7, %p968_p2  ;;  %p974_p10 = scmp.lt.s32.totalorder %s972_s16, %s967_s13 }
  0x41   : > { %p971_p12 = pneg %p970_p9  ;;  %p975_p0 = por %p974_p10, %p973_p13 }
  0x43   : > { %p976_p3 = pnand %p975_p0, %p971_p12 }
  0x45   : > { %979 = shalt.err (!%p976_p3)
}
  0x46   : > { %s980_s22 = scalar_lea.vmem %s283_s23, 128  ;;  %s1104_s19 = smov [#allocation6]  }
  0x47   : > { %p981_p1 = scmp.ne.s32.totalorder %s283_s23, %s980_s22  ;;  %s985_s0 = sshll.u32 %s1104_s19, 4  ;;  %s986_s0 = int_to_ptr.vmem [resolvable:$false] %s985_s0 }
  0x48   : > { %s987_s2 = scalar_lea.vmem %s986_s0, 256  ;;  %p988_p2 = scmp.lt.s32.totalorder %s283_s23, %s986_s0 }
  0x49   : > { %p983_p6 = pnand %p981_p1, %p969_p7  ;;  %p989_p9 = scmp.lt.s32.totalorder %s987_s2, %s980_s22 }
  0x4b   : > { %p984_p5 = pneg %p983_p6  ;;  %p990_p4 = por %p989_p9, %p988_p2 }
  0x4d   : > { %p991_p8 = pnand %p990_p4, %p984_p5 }
  0x4f   : > { %994 = shalt.err (!%p991_p8)
}
  0x50   : > { %836 = dma.hbm_to_vmem [thread:$0]  (!%p1256_p11), %s1254_s21, 128, %s283_s23, %s272_s10  }
  0x51   : > { %p1425_p12 = scmp.ne.s32.totalorder %s1419_s9, 0 }
  0x52   : > { %p1426_p13 = scmp.eq.s32.totalorder (!%p1425_p12), %s1175_s28, 0 }
  0x53   : > { %291 = sbr.rel (%p1425_p12) target bundleno = 819 (0x333), region = 44 }
  0x58   : > { %1064 = dma.done.wait (%p1426_p13), [#allocation5], 16   ;;  %p1427_p1 = pmov %p1426_p13 }
  0x59   : > { %s1281_s0 = sand.u32 1, %s1089_s25   ;;  %p1428_p4 = scmp.ne.s32.totalorder %s1417_s30, 0 }
  0x5a   : > { %1066 = vsyncadd (%p1427_p1), [#allocation5], 4294967280  ;;  %s751_s2 = sshll.u32 %s1281_s0, 3  ;;  %s298_s13 = scalar_lea.sflag [#allocation3], %s1281_s0 }
  0x5b   : > { %s301_s29 = scalar_lea.vmem [#allocation6], %s751_s2 }
  0x5c   : > { %1068 = dma.done.wait (%p1428_p4), %s298_s13, 128  }
  0x5d   : > { %1070 = vsyncadd (%p1428_p4), %s298_s13, 4294967168  ;;  %p1429_p6 = pmov %p1427_p1 }
  0x5e   : > { %p1430_p8 = pmov %p1427_p1 }
  0x5f   : > { %1072 = dma.done.wait (%p1429_p6), [#allocation8], 512  }
  0x60   : > { %1074 = vsyncadd (%p1430_p8), [#allocation8], 4294966784 }
  0x61   : > { %314 = sfence }
  0x62   : > { %v347_v0 = vld [vmem:[%s301_s29] sm:$0xff]  ;;  %vm350_vm0 = vcmask 261120   ;;  %v896_v7 = vld [vmem:[#allocation7 + $0x8] sm:$0xff]   ;;  %v1105_v9 = vmov 0.0   ;;  %v898_v10 = vld [vmem:[#allocation7] sm:$0xff]   ;;  %vm1106_vm1 = vmmov 0  }
  0x63   : > { %v351_v1 = vsel %vm350_vm0, %v347_v0, 0.0  ;;  %v897_v8 = vld [vmem:[#allocation9 + $0x8] sm:$0xff]   ;;  %789 = vmatprep.subr.bf16.mxu0 %v1105_v9  ;;  %797 = vmatprep.subr.bf16.mxu1 %v1105_v9  ;;  %v899_v11 = vld [vmem:[#allocation9] sm:$0xff]   ;;  %s348_s30 = sld [smem:[#allocation2]]  ;;  %s754_s10 = sshll.u32 %s1281_s0, 4  ;;  %vm539_vm4 = vcmask 60416  }
  0x64   : > { %352 = vadd.xlane.f32.xlu0 %v351_v1  ;;  %790 = vmatpush3.bf16.msra.mxu0 %v896_v7  ;;  %s756_s9 = sld [smem:[#allocation2 + $0x1]]  ;;  %v761_v27 = vld [vmem:[%s1408_s5] ss:$0 sm:$0xff]  ;;  %s1107_s12 = smov 104  }
  0x65   : > { %798 = vmatpush3.bf16.msra.mxu1 %v897_v8  ;;  %791 = vmatprep.subr.bf16.mxu0 %v1105_v9  ;;  %s1108_s20 = smov 120   ;;  %s345_s16 = scalar_lea.vmem [#allocation11], %s754_s10  ;;  %v757_v38 = vld [vmem:[%s1406_s3] ss:$0 sm:$0xff] }
  0x66   : > { %799 = vmatprep.subr.bf16.mxu1 %v1105_v9  ;;  %793 = vmatprep.mubr.msk.bf16.mxu0 %vm1106_vm1, %v1105_v9  ;;  %s1109_s17 = smov 112   ;;  %s605_s19 = sshll.u32 %s345_s16, 4  ;;  %s1309_s19 = int_to_ptr.vmem [resolvable:$true] %s605_s19 }
  0x67   : > { %801 = vmatprep.mubr.msk.bf16.mxu1 %vm1106_vm1, %v1105_v9  ;;  %s781_s2 = sshll.u32 %s1175_s28, 8  ;;  %s995_s21 = scalar_lea.vmem %s1309_s19, 256 }
  0x68   : > { %792 = vmatpush3.bf16.msra.mxu0 %v898_v10  ;;  %p996_p5 = scmp.ne.s32.totalorder %s1309_s19, %s995_s21  ;;  %p1431_p11 = scmp.ne.s32.totalorder %s1423_s18, 0 }
  0x69   : > { %800 = vmatpush3.bf16.msra.mxu1 %v899_v11  ;;  %v369_v20 = vstv %s348_s30  ;;  %s1317_s30 = scalar_lea.hbm %s1410_s7, %s781_s2  ;;  %s1110_s23 = smov [#allocation11]  }
  0x6a   : > { %v374_v23 = vstv %s756_s9  ;;  %s576_s9 = scalar_lea.sflag [#allocation12], %s1281_s0  ;;  %p997_p7 = pnand %p996_p5, %p1431_p11 }
  0x6c   : > { %p998_p10 = pneg %p997_p7 }
  0xed   : > { %v353_v2 = vpop.xlane.xlu0 %352 }
  0xee   : > { %v355_v3 = vmul.f32 0.03125, %v353_v2 }
  0xf0   : > { %v356_v4 = vsub.f32 %v347_v0, %v355_v3 }
  0xf2   : > { %v357_v5 = vmul.f32 %v356_v4, %v356_v4  ;;  %v370_v21 = vmul.f32 %v369_v20, %v356_v4 }
  0xf4   : > { %v358_v6 = vsel %vm350_vm0, %v357_v5, 0.0 }
  0xf5   : > { %359 = vadd.xlane.f32.xlu0 %v358_v6 }
 0x17e   : > { %v360_v12 = vpop.xlane.xlu0 %359 }
 0x17f   : > { %v361_v13 = vmul.f32 0.032258064, %v360_v12 }
 0x181   : > { %900 = vrsqrt.f32 %v361_v13  ;;  %vm364_vm2 = vcmp.eq.f32.partialorder %v361_v13, inf  ;;  %v367_v16 = vand.u32 2147483648, %v361_v13  ;;  %vm366_vm3 = vcmp.eq.f32.partialorder %v361_v13, 0.0 }
 0x18e   : > { %v901_v14 = vpop.eup %900 }
 0x18f   : > { %v363_v15 = vmul.f32 %v901_v14, %v361_v13 }
 0x191   : > { %v365_v17 = vsel %vm364_vm2, %v361_v13, %v363_v15 }
 0x192   : > { %v368_v18 = vsel %vm366_vm3, %v367_v16, %v365_v17 }
 0x193   : > { %v371_v19 = vadd.f32 1e-06, %v368_v18 }
 0x195   : > { %902 = vrcp.f32 %v371_v19 }
 0x1a2   : > { %v903_v22 = vpop.eup %902 }
 0x1a3   : > { %v373_v24 = vmul.f32 %v903_v22, %v370_v21 }
 0x1a5   : > { %v375_v25 = vadd.f32 %v374_v23, %v373_v24 }
 0x1a7   : > { %v376_v26 = vpack.c.bf16 %v375_v25, %v375_v25 }
 0x1a9   : > { %794 = vmatmul.mubr.msk.bf16.vlgmr.msra.gmra.mxu0 %vm350_vm0, %v376_v26  ;;  %802 = vmatmul.mubr.msk.bf16.vlgmr.msra.gmra.mxu1 %vm350_vm0, %v376_v26 }
 0x269   : > { %v437_v28 = vpop.f32.mrf.mxu0  ;;  %v500_v29 = vpop.f32.mrf.mxu1 }
 0x26a   : > { %v501_v30 = vadd.f32 %v761_v27, %v500_v29  ;;  %v438_v39 = vadd.f32 %v757_v38, %v437_v28 }
 0x26b   : > { %v795_v31 = vpop.f32.mrf.mxu0  ;;  %v803_v32 = vpop.f32.mrf.mxu1 }
 0x26c   : > { %v541_v33 = vpack.c.bf16 %v501_v30, %v501_v30 }
 0x26d   : > { %v440_v34 = vpop.f32.mrf.mxu0  ;;  %v503_v35 = vpop.f32.mrf.mxu1 }
 0x26e   : > { %565 = vrot.lane.b32.xlu0 %v541_v33, %s1107_s12  ;;  %549 = vrot.lane.b32.xlu1 %v541_v33, %s1108_s20  ;;  %542 = vst.msk [vmem:[%s345_s16] sm:$0xf] %vm539_vm4, %v541_v33  ;;  %s999_s12 = sshll.u32 %s1110_s23, 4  ;;  %s1000_s12 = int_to_ptr.vmem [resolvable:$false] %s999_s12 }
 0x26f   : > { %v796_v36 = vpop.f32.mrf.mxu0  ;;  %v804_v37 = vpop.f32.mrf.mxu1  ;;  %s1001_s20 = scalar_lea.vmem %s1000_s12, 512  ;;  %p1002_p0 = scmp.lt.s32.totalorder %s1309_s19, %s1000_s12 }
 0x270   : > { %p1003_p3 = scmp.lt.s32.totalorder %s1001_s20, %s995_s21 }
 0x272   : > { %557 = vrot.lane.b32.xlu1 %v541_v33, %s1109_s17  ;;  %p1004_p2 = por %p1003_p3, %p1002_p0 }
 0x274   : > { %p1005_p9 = pnand %p1004_p2, %p998_p10 }
 0x29b   : > { %506 = vxpose.xlu1.b32.start.end [1/1] (short) (narrow) %v438_v39, 32 }
 0x2e0   : > { %v566_v40 = vpop.permute.xlu0 %565  ;;  %v550_v41 = vpop.permute.xlu1 %549 }
 0x2e1   : > { %771 = vst.msk [vmem:[%s345_s16 + $0xc] sm:$0xf] %vm539_vm4, %v566_v40  ;;  %767 = vst.msk [vmem:[%s345_s16 + $0x4] sm:$0xf] %vm539_vm4, %v550_v41 }
 0x2e4   : > { %v558_v42 = vpop.permute.xlu1 %557 }
 0x2e5   : > { %769 = vst.msk [vmem:[%s345_s16 + $0x8] sm:$0xf] %vm539_vm4, %v558_v42 }
 0x2e6   : > { %1008 = shalt.err (!%p1005_p9)
}
 0x2e7   : > { %s1009_s16 = scalar_lea.hbm %s1317_s30, 256  ;;  %s1013_s22 = scalar_lea.hbm %s1410_s7, 512 }
 0x2e8   : > { %p1010_p12 = scmp.ne.s32.totalorder %s1317_s30, %s1009_s16  ;;  %p1014_p4 = scmp.lt.s32.totalorder %s1317_s30, %s1410_s7 }
 0x2e9   : > { %p1015_p6 = scmp.lt.s32.totalorder %s1013_s22, %s1009_s16 }
 0x2ea   : > { %p1011_p13 = pnand %p1010_p12, %p1431_p11 }
 0x2eb   : > { %p1016_p8 = por %p1015_p6, %p1014_p4 }
 0x2ec   : > { %p1012_p1 = pneg %p1011_p13 }
 0x2ee   : > { %p1017_p5 = pnand %p1016_p8, %p1012_p1 }
 0x2f0   : > { %1020 = shalt.err (!%p1017_p5)
}
 0x2f1   : > { %s1111_s21 = smov 64   ;;  %s1112_s23 = smov 4  }
 0x2f2   : > { %820 = dma.vmem_to_hbm [thread:$0]  (%p1431_p11), %s1309_s19, 256, %s1317_s30, %s576_s9, %s1111_s21, %s1111_s21, %s1112_s23  }
 0x2f3   : > { %s338_s12 = scalar_lea.vmem [#allocation10], %s754_s10  ;;  %s1358_s30 = scalar_lea.hbm %s1409_s6, %s781_s2 }
 0x2f4   : > { %s589_s20 = sshll.u32 %s338_s12, 4  ;;  %s571_s9 = scalar_lea.sflag [#allocation4], %s1281_s0  ;;  %s1351_s20 = int_to_ptr.vmem [resolvable:$true] %s589_s20 }
 0x2f5   : > { %s1021_s16 = scalar_lea.vmem %s1351_s20, 256  ;;  %s1113_s17 = smov [#allocation10]  }
 0x2f6   : > { %p1022_p7 = scmp.ne.s32.totalorder %s1351_s20, %s1021_s16  ;;  %s1025_s14 = sshll.u32 %s1113_s17, 4  ;;  %s1026_s14 = int_to_ptr.vmem [resolvable:$false] %s1025_s14 }
 0x2f7   : > { %s1027_s22 = scalar_lea.vmem %s1026_s14, 512  ;;  %p1028_p3 = scmp.lt.s32.totalorder %s1351_s20, %s1026_s14 }
 0x2f8   : > { %p1023_p10 = pnand %p1022_p7, %p1431_p11  ;;  %p1029_p2 = scmp.lt.s32.totalorder %s1027_s22, %s1021_s16 }
 0x2fa   : > { %p1024_p0 = pneg %p1023_p10  ;;  %p1030_p9 = por %p1029_p2, %p1028_p3 }
 0x2fc   : > { %p1031_p12 = pnand %p1030_p9, %p1024_p0 }
 0x317   : > { %v522_v43 = vpop.trf.xlu1 }
 0x318   : > { %v538_v44 = vpack.c.bf16 %v522_v43, %v522_v43 }
 0x31a   : > { %540 = vst.msk [vmem:[%s338_s12] sm:$0xf] %vm539_vm4, %v538_v44 }
 0x31b   : > { %v523_v45 = vpop.trf.xlu1 }
 0x31c   : > { %v543_v46 = vpack.c.bf16 %v523_v45, %v523_v45 }
 0x31e   : > { %765 = vst.msk [vmem:[%s338_s12 + $0x4] sm:$0xf] %vm539_vm4, %v543_v46 }
 0x31f   : > { %v524_v47 = vpop.trf.xlu1 }
 0x320   : > { %v554_v48 = vpack.c.bf16 %v524_v47, %v524_v47 }
 0x322   : > { %768 = vst.msk [vmem:[%s338_s12 + $0x8] sm:$0xf] %vm539_vm4, %v554_v48 }
 0x323   : > { %v525_v49 = vpop.trf.xlu1 }
 0x324   : > { %v562_v50 = vpack.c.bf16 %v525_v49, %v525_v49 }
 0x326   : > { %770 = vst.msk [vmem:[%s338_s12 + $0xc] sm:$0xf] %vm539_vm4, %v562_v50 }
 0x327   : > { %1034 = shalt.err (!%p1031_p12)
}
 0x328   : > { %s1035_s28 = scalar_lea.hbm %s1358_s30, 256  ;;  %s1039_s13 = scalar_lea.hbm %s1409_s6, 512 }
 0x329   : > { %p1036_p13 = scmp.ne.s32.totalorder %s1358_s30, %s1035_s28  ;;  %p1040_p6 = scmp.lt.s32.totalorder %s1358_s30, %s1409_s6 }
 0x32a   : > { %p1041_p8 = scmp.lt.s32.totalorder %s1039_s13, %s1035_s28 }
 0x32b   : > { %p1037_p1 = pnand %p1036_p13, %p1431_p11 }
 0x32c   : > { %p1042_p5 = por %p1041_p8, %p1040_p6 }
 0x32d   : > { %p1038_p4 = pneg %p1037_p1 }
 0x32f   : > { %p1043_p7 = pnand %p1042_p5, %p1038_p4 }
 0x331   : > { %1046 = shalt.err (!%p1043_p7)
}
 0x332   : > { %819 = dma.vmem_to_hbm [thread:$0]  (%p1431_p11), %s1351_s20, 256, %s1358_s30, %s571_s9, %s1111_s21, %s1111_s21, %s1112_s23  }
 0x333 PF: > { %s620_s10 = sand.u32 1, %s1085_s24   ;;  %p1432_p10 = scmp.ne.s32.totalorder %s1418_s8, 0 }
 0x334   : > { %p1433_p0 = scmp.ge.s32.totalorder %s1097_s27, 2  ;;  %s621_s19 = scalar_lea.sflag [#allocation4], %s620_s10 }
 0x336   : > { %p838_p3 = pnand %p1433_p0, %p1432_p10 }
 0x338   : > { %p839_p2 = pneg %p838_p3 }
 0x33a   : > { %1076 = dma.done.wait (%p839_p2), %s621_s19, 256  }
 0x33b   : > { %1078 = vsyncadd (%p839_p2), %s621_s19, 4294967040  ;;  %s630_s16 = scalar_lea.sflag [#allocation12], %s620_s10 }
 0x33c   : > { %1080 = dma.done.wait (%p839_p2), %s630_s16, 256  }
 0x33d   : > { %1082 = vsyncadd (%p839_p2), %s630_s16, 4294967040  ;;  %p26_p11 = scmp.ge.s32.totalorder %s1231_s11, 4   ;;  %s1434_s24 = smov %s1089_s25 }
 0x33e   : > { %s1435_s25 = smov %s1093_s26  ;;  %s1436_s26 = smov %s1241_s15 }
 0x33f   : > { %s1437_s27 = smov %s1231_s11  ;;  %28 = sbr.rel (!%p26_p11) target bundleno = 12 (0xc), region = 125 }
 0x344   :  { %635 = vsyncpa [#allocation3], 1 }
 0x345   :  { %637 = vsyncpa [#allocation3 + $0x1], 1 }
 0x346   :  { %638 = vsyncpa [#allocation8], 1 }
 0x347   :  { %639 = vsyncpa [#allocation4], 1 }
 0x348   :  { %641 = vsyncpa [#allocation4 + $0x1], 1 }
 0x349   :  { %642 = vsyncpa [#allocation12], 1 }
 0x34a   :  { %644 = vsyncpa [#allocation12 + $0x1], 1 }
 0x34b   :  { %645 = vsyncpa [#allocation5], 1 }
 0x34c   :  { %647 = vsyncpa [#allocation5 + $0x1], 1 }

// kernel: tpu_custom_call.1
= control target key start
LH: loop header
LB: loop body
LE: loop exit
PB: predicated region body
PF: predicated region fallthrough
CT: control target
= control target key end

     0   :  { %s1403_s0 = inlined_call_operand.hbm [shape: f32[4], index: 0, kind: input, shape index: {}]   ;;  %s1404_s1 = inlined_call_operand.hbm [shape: f32[2,8,32], index: 1, kind: input, shape index: {}]   ;;  %s1405_s2 = inlined_call_operand.hbm [shape: bf16[32,32], index: 2, kind: input, shape index: {}]   ;;  %s1406_s3 = inlined_call_operand.vmem [shape: f32[1,32], index: 3, kind: input, shape index: {}]   ;;  %s1407_s4 = inlined_call_operand.hbm [shape: bf16[32,32], index: 4, kind: input, shape index: {}]   ;;  %s1408_s5 = inlined_call_operand.vmem [shape: f32[1,32], index: 5, kind: input, shape index: {}]   ;;  %s1409_s6 = inlined_call_operand.hbm [shape: bf16[2,4,8,8], index: 6, kind: output, shape index: {0}]   ;;  %s1410_s7 = inlined_call_operand.hbm [shape: bf16[2,4,8,8], index: 7, kind: output, shape index: {1}]  }
   0x1   :  { %1415 = sst [smem:[#allocation18_spill]] %s1403_s0 }
   0x2   :  { %1416 = sst [smem:[#allocation19_spill]] %s1405_s2 }
   0x3   :  { %13 = vsyncpa [#allocation5], 0 }
   0x4   :  { %14 = vsyncpa [#allocation3], 0 }
   0x5   :  { %16 = vsyncpa [#allocation3 + $0x1], 0 }
   0x6   :  { %17 = vsyncpa [#allocation8], 0 }
   0x7   :  { %18 = vsyncpa [#allocation4], 0 }
   0x8   :  { %20 = vsyncpa [#allocation4 + $0x1], 0 }
   0x9   :  { %21 = vsyncpa [#allocation12], 0 }
   0xa   :  { %23 = vsyncpa [#allocation12 + $0x1], 0  ;;  %s1154_s24 = smov 0   ;;  %s1156_s25 = smov 0  }
   0xb   :  { %s1158_s26 = smov 0   ;;  %s1160_s27 = smov 0  }
   0xc LB: > { %s1175_s28 = sadd.s32 4294967295, %s1097_s27   ;;  %s741_s29 = sadd.s32 4294967294, %s1097_s27   ;;  %s1097_s27 = sphi %s1160_s27, %s1437_s27   ;;  %s1093_s26 = sphi %s1158_s26, %s1436_s26   ;;  %s1089_s25 = sphi %s1156_s25, %s1435_s25   ;;  %s1085_s24 = sphi %s1154_s24, %s1434_s24  }
   0xd   : > { %p70_p0 = scmp.ne.s32.totalorder %s1089_s25, %s1085_s24  ;;  %p1411_p1 = scmp.eq.s32.totalorder %s1175_s28, 0 }
   0xe   : > { %p178_p2 = scmp.eq.s32.totalorder %s1175_s28, 1  ;;  %p184_p3 = scmp.eq.s32.totalorder %s741_s29, 1 }
   0xf   : > { %p1184_p4 = por %p1411_p1, %p70_p0  ;;  %p742_p5 = scmp.ge.s32.totalorder %s1097_s27, 1 }
  0x10   : > { %p1189_p6 = por %p184_p3, %p70_p0  ;;  %p217_p7 = scmp.lt.s32.totalorder %s1097_s27, 3 }
  0x11   : > { %s1417_s30 = scalar_select %p1184_p4, 1, 0 }
  0x12   : > { %s1418_s8 = scalar_select %p1189_p6, 1, 0 }
  0x13   : > { %p1194_p8 = pnand %p742_p5, %p217_p7  ;;  %s1099_s10 = smov [#allocation7]  }
  0x14   : > { %s238_s11 = sshll.u32 %s1099_s10, 4  ;;  %s1100_s13 = smov [#allocation9]   ;;  %s239_s11 = int_to_ptr.vmem [resolvable:$true] %s238_s11 }
  0x15   : > { %s1419_s9 = scalar_select %p1194_p8, 1, 0 }
  0x16   : > { %p823_p9 = pneg %p1194_p8  ;;  %s254_s14 = sshll.u32 %s1100_s13, 4  ;;  %s255_s14 = int_to_ptr.vmem [resolvable:$true] %s254_s14 }
  0x17   : > { %s915_s15 = scalar_lea.vmem %s239_s11, 256  ;;  %p923_p5 = scmp.lt.s32.totalorder %s239_s11, %s239_s11 }
  0x18   : > { %p1203_p11 = pnand %p823_p9, %p1411_p1  ;;  %p916_p13 = scmp.ne.s32.totalorder %s239_s11, %s915_s15 }
  0x19   : > { %p924_p7 = scmp.lt.s32.totalorder %s915_s15, %s915_s15 }
  0x1a   : > { %p906_p12 = pneg %p1203_p11 }
  0x1b   : > { %p925_p10 = por %p924_p7, %p923_p5 }
  0x1c   : > { %p918_p0 = pnand %p916_p13, %p906_p12 }
  0x1e   : > { %p919_p3 = pneg %p918_p0 }
  0x20   : > { %p926_p9 = pnand %p925_p10, %p919_p3 }
  0x22   : > { %929 = shalt.err (!%p926_p9)
}
  0x23   : > { %s1101_s16 = smov 64   ;;  %s1102_s17 = smov 4  }
  0x24   : > { %s1421_s2 = sld [smem:[#allocation19_spill]]  ;;  %s1103_s20 = smov [#allocation2]  }
  0x25   : > { %s1422_s0 = sld [smem:[#allocation18_spill]]  ;;  %s952_s23 = scalar_lea.vmem %s255_s14, 256 }
  0x26   : > { %p953_p13 = scmp.ne.s32.totalorder %s255_s14, %s952_s23  ;;  %p960_p3 = scmp.lt.s32.totalorder %s255_s14, %s255_s14 }
  0x27   : > { %p961_p5 = scmp.lt.s32.totalorder %s952_s23, %s952_s23 }
  0x28   : > { %p955_p10 = pnand %p953_p13, %p906_p12 }
  0x29   : > { %p962_p7 = por %p961_p5, %p960_p3 }
  0x2a   : > { %829 = dma.hbm_to_vmem [thread:$0]  (!%p1203_p11), %s1421_s2, 256, %s239_s11, [#allocation8], %s1101_s16, %s1101_s16, %s1102_s17  }
  0x2b   : > { %826 = dma.hbm_to_smem (!%p1203_p11), %s1422_s0, 16, %s1103_s20, [#allocation5]  }
  0x2c   : > { %p956_p0 = pneg %p955_p10 }
  0x2e   : > { %p963_p9 = pnand %p962_p7, %p956_p0 }
  0x30   : > { %966 = shalt.err (!%p963_p9)
}
  0x31   : > { %832 = dma.hbm_to_vmem [thread:$0]  (!%p1203_p11), %s1407_s4, 256, %s255_s14, [#allocation8], %s1101_s16, %s1101_s16, %s1102_s17  }
  0x32   : > { %s1231_s11 = sadd.s32 1, %s1097_s27   ;;  %s57_s12 = sadd.s32 1, %s1093_s26 }
  0x33   : > { %s54_s13 = ssub.s32 %s1097_s27, %s1231_s11  ;;  %p64_p13 = scmp.ne.s32.totalorder %s1093_s26, %s1089_s25 }
  0x34   : > { %p55_p12 = scmp.eq.s32.totalorder %s54_s13, 0  ;;  %p65_p10 = scmp.eq.s32.totalorder %s1097_s27, 0 }
  0x35   : > { %p847_p0 = scmp.lt.s32.totalorder %s1097_s27, 2  ;;  %p1245_p5 = por %p178_p2, %p64_p13 }
  0x36   : > { %s1241_s15 = scalar_select %p55_p12, %s1093_s26, %s57_s12  }
  0x37   : > { %p66_p3 = por %p65_p10, %p64_p13  ;;  %s271_s19 = sand.u32 1, %s1093_s26  }
  0x38   : > { %s1423_s18 = scalar_select %p1245_p5, 1, 0 }
  0x39   : > { %s748_s20 = sshll.u32 %s1097_s27, 7  ;;  %s747_s14 = sshll.u32 %s271_s19, 3 }
  0x3a   : > { %s1254_s21 = scalar_lea.hbm %s1404_s1, %s748_s20  ;;  %s275_s22 = scalar_lea.vmem [#allocation6], %s747_s14 }
  0x3b   : > { %s282_s23 = sshll.u32 %s275_s22, 4  ;;  %p1256_p11 = pnand %p847_p0, %p66_p3  ;;  %s283_s23 = int_to_ptr.vmem [resolvable:$true] %s282_s23 }
  0x3c   : > { %s272_s10 = scalar_lea.sflag [#allocation3], %s271_s19  ;;  %s967_s13 = scalar_lea.hbm %s1254_s21, 128 }
  0x3d   : > { %p968_p2 = scmp.ne.s32.totalorder %s1254_s21, %s967_s13  ;;  %p969_p7 = pneg %p1256_p11 }
  0x3e   : > { %s972_s16 = scalar_lea.hbm %s1404_s1, 256  ;;  %p973_p13 = scmp.lt.s32.totalorder %s1254_s21, %s1404_s1 }
  0x3f   : > { %p970_p9 = pnand %p969_p7, %p968_p2  ;;  %p974_p10 = scmp.lt.s32.totalorder %s972_s16, %s967_s13 }
  0x41   : > { %p971_p12 = pneg %p970_p9  ;;  %p975_p0 = por %p974_p10, %p973_p13 }
  0x43   : > { %p976_p3 = pnand %p975_p0, %p971_p12 }
  0x45   : > { %979 = shalt.err (!%p976_p3)
}
  0x46   : > { %s980_s22 = scalar_lea.vmem %s283_s23, 128  ;;  %s1104_s19 = smov [#allocation6]  }
  0x47   : > { %p981_p1 = scmp.ne.s32.totalorder %s283_s23, %s980_s22  ;;  %s985_s0 = sshll.u32 %s1104_s19, 4  ;;  %s986_s0 = int_to_ptr.vmem [resolvable:$false] %s985_s0 }
  0x48   : > { %s987_s2 = scalar_lea.vmem %s986_s0, 256  ;;  %p988_p2 = scmp.lt.s32.totalorder %s283_s23, %s986_s0 }
  0x49   : > { %p983_p6 = pnand %p981_p1, %p969_p7  ;;  %p989_p9 = scmp.lt.s32.totalorder %s987_s2, %s980_s22 }
  0x4b   : > { %p984_p5 = pneg %p983_p6  ;;  %p990_p4 = por %p989_p9, %p988_p2 }
  0x4d   : > { %p991_p8 = pnand %p990_p4, %p984_p5 }
  0x4f   : > { %994 = shalt.err (!%p991_p8)
}
  0x50   : > { %836 = dma.hbm_to_vmem [thread:$0]  (!%p1256_p11), %s1254_s21, 128, %s283_s23, %s272_s10  }
  0x51   : > { %p1425_p12 = scmp.ne.s32.totalorder %s1419_s9, 0 }
  0x52   : > { %p1426_p13 = scmp.eq.s32.totalorder (!%p1425_p12), %s1175_s28, 0 }
  0x53   : > { %291 = sbr.rel (%p1425_p12) target bundleno = 819 (0x333), region = 44 }
  0x58   : > { %1064 = dma.done.wait (%p1426_p13), [#allocation5], 16   ;;  %p1427_p1 = pmov %p1426_p13 }
  0x59   : > { %s1281_s0 = sand.u32 1, %s1089_s25   ;;  %p1428_p4 = scmp.ne.s32.totalorder %s1417_s30, 0 }
  0x5a   : > { %1066 = vsyncadd (%p1427_p1), [#allocation5], 4294967280  ;;  %s751_s2 = sshll.u32 %s1281_s0, 3  ;;  %s298_s13 = scalar_lea.sflag [#allocation3], %s1281_s0 }
  0x5b   : > { %s301_s29 = scalar_lea.vmem [#allocation6], %s751_s2 }
  0x5c   : > { %1068 = dma.done.wait (%p1428_p4), %s298_s13, 128  }
  0x5d   : > { %1070 = vsyncadd (%p1428_p4), %s298_s13, 4294967168  ;;  %p1429_p6 = pmov %p1427_p1 }
  0x5e   : > { %p1430_p8 = pmov %p1427_p1 }
  0x5f   : > { %1072 = dma.done.wait (%p1429_p6), [#allocation8], 512  }
  0x60   : > { %1074 = vsyncadd (%p1430_p8), [#allocation8], 4294966784 }
  0x61   : > { %314 = sfence }
  0x62   : > { %v347_v0 = vld [vmem:[%s301_s29] sm:$0xff]  ;;  %vm350_vm0 = vcmask 261120   ;;  %v896_v7 = vld [vmem:[#allocation7 + $0x8] sm:$0xff]   ;;  %v1105_v9 = vmov 0.0   ;;  %v898_v10 = vld [vmem:[#allocation7] sm:$0xff]   ;;  %vm1106_vm1 = vmmov 0  }
  0x63   : > { %v351_v1 = vsel %vm350_vm0, %v347_v0, 0.0  ;;  %v897_v8 = vld [vmem:[#allocation9 + $0x8] sm:$0xff]   ;;  %789 = vmatprep.subr.bf16.mxu0 %v1105_v9  ;;  %797 = vmatprep.subr.bf16.mxu1 %v1105_v9  ;;  %v899_v11 = vld [vmem:[#allocation9] sm:$0xff]   ;;  %s348_s30 = sld [smem:[#allocation2]]  ;;  %s754_s10 = sshll.u32 %s1281_s0, 4  ;;  %vm539_vm4 = vcmask 60416  }
  0x64   : > { %352 = vadd.xlane.f32.xlu0 %v351_v1  ;;  %790 = vmatpush3.bf16.msra.mxu0 %v896_v7  ;;  %s756_s9 = sld [smem:[#allocation2 + $0x1]]  ;;  %v761_v27 = vld [vmem:[%s1408_s5] ss:$0 sm:$0xff]  ;;  %s1107_s12 = smov 104  }
  0x65   : > { %798 = vmatpush3.bf16.msra.mxu1 %v897_v8  ;;  %791 = vmatprep.subr.bf16.mxu0 %v1105_v9  ;;  %s1108_s20 = smov 120   ;;  %s345_s16 = scalar_lea.vmem [#allocation11], %s754_s10  ;;  %v757_v38 = vld [vmem:[%s1406_s3] ss:$0 sm:$0xff] }
  0x66   : > { %799 = vmatprep.subr.bf16.mxu1 %v1105_v9  ;;  %793 = vmatprep.mubr.msk.bf16.mxu0 %vm1106_vm1, %v1105_v9  ;;  %s1109_s17 = smov 112   ;;  %s605_s19 = sshll.u32 %s345_s16, 4  ;;  %s1309_s19 = int_to_ptr.vmem [resolvable:$true] %s605_s19 }
  0x67   : > { %801 = vmatprep.mubr.msk.bf16.mxu1 %vm1106_vm1, %v1105_v9  ;;  %s781_s2 = sshll.u32 %s1175_s28, 8  ;;  %s995_s21 = scalar_lea.vmem %s1309_s19, 256 }
  0x68   : > { %792 = vmatpush3.bf16.msra.mxu0 %v898_v10  ;;  %p996_p5 = scmp.ne.s32.totalorder %s1309_s19, %s995_s21  ;;  %p1431_p11 = scmp.ne.s32.totalorder %s1423_s18, 0 }
  0x69   : > { %800 = vmatpush3.bf16.msra.mxu1 %v899_v11  ;;  %v369_v20 = vstv %s348_s30  ;;  %s1317_s30 = scalar_lea.hbm %s1410_s7, %s781_s2  ;;  %s1110_s23 = smov [#allocation11]  }
  0x6a   : > { %v374_v23 = vstv %s756_s9  ;;  %s576_s9 = scalar_lea.sflag [#allocation12], %s1281_s0  ;;  %p997_p7 = pnand %p996_p5, %p1431_p11 }
  0x6c   : > { %p998_p10 = pneg %p997_p7 }
  0xed   : > { %v353_v2 = vpop.xlane.xlu0 %352 }
  0xee   : > { %v355_v3 = vmul.f32 0.03125, %v353_v2 }
  0xf0   : > { %v356_v4 = vsub.f32 %v347_v0, %v355_v3 }
  0xf2   : > { %v357_v5 = vmul.f32 %v356_v4, %v356_v4  ;;  %v370_v21 = vmul.f32 %v369_v20, %v356_v4 }
  0xf4   : > { %v358_v6 = vsel %vm350_vm0, %v357_v5, 0.0 }
  0xf5   : > { %359 = vadd.xlane.f32.xlu0 %v358_v6 }
 0x17e   : > { %v360_v12 = vpop.xlane.xlu0 %359 }
 0x17f   : > { %v361_v13 = vmul.f32 0.032258064, %v360_v12 }
 0x181   : > { %900 = vrsqrt.f32 %v361_v13  ;;  %vm364_vm2 = vcmp.eq.f32.partialorder %v361_v13, inf  ;;  %v367_v16 = vand.u32 2147483648, %v361_v13  ;;  %vm366_vm3 = vcmp.eq.f32.partialorder %v361_v13, 0.0 }
 0x18e   : > { %v901_v14 = vpop.eup %900 }
 0x18f   : > { %v363_v15 = vmul.f32 %v901_v14, %v361_v13 }
 0x191   : > { %v365_v17 = vsel %vm364_vm2, %v361_v13, %v363_v15 }
 0x192   : > { %v368_v18 = vsel %vm366_vm3, %v367_v16, %v365_v17 }
 0x193   : > { %v371_v19 = vadd.f32 1e-06, %v368_v18 }
 0x195   : > { %902 = vrcp.f32 %v371_v19 }
 0x1a2   : > { %v903_v22 = vpop.eup %902 }
 0x1a3   : > { %v373_v24 = vmul.f32 %v903_v22, %v370_v21 }
 0x1a5   : > { %v375_v25 = vadd.f32 %v374_v23, %v373_v24 }
 0x1a7   : > { %v376_v26 = vpack.c.bf16 %v375_v25, %v375_v25 }
 0x1a9   : > { %794 = vmatmul.mubr.msk.bf16.vlgmr.msra.gmra.mxu0 %vm350_vm0, %v376_v26  ;;  %802 = vmatmul.mubr.msk.bf16.vlgmr.msra.gmra.mxu1 %vm350_vm0, %v376_v26 }
 0x269   : > { %v437_v28 = vpop.f32.mrf.mxu0  ;;  %v500_v29 = vpop.f32.mrf.mxu1 }
 0x26a   : > { %v501_v30 = vadd.f32 %v761_v27, %v500_v29  ;;  %v438_v39 = vadd.f32 %v757_v38, %v437_v28 }
 0x26b   : > { %v795_v31 = vpop.f32.mrf.mxu0  ;;  %v803_v32 = vpop.f32.mrf.mxu1 }
 0x26c   : > { %v541_v33 = vpack.c.bf16 %v501_v30, %v501_v30 }
 0x26d   : > { %v440_v34 = vpop.f32.mrf.mxu0  ;;  %v503_v35 = vpop.f32.mrf.mxu1 }
 0x26e   : > { %565 = vrot.lane.b32.xlu0 %v541_v33, %s1107_s12  ;;  %549 = vrot.lane.b32.xlu1 %v541_v33, %s1108_s20  ;;  %542 = vst.msk [vmem:[%s345_s16] sm:$0xf] %vm539_vm4, %v541_v33  ;;  %s999_s12 = sshll.u32 %s1110_s23, 4  ;;  %s1000_s12 = int_to_ptr.vmem [resolvable:$false] %s999_s12 }
 0x26f   : > { %v796_v36 = vpop.f32.mrf.mxu0  ;;  %v804_v37 = vpop.f32.mrf.mxu1  ;;  %s1001_s20 = scalar_lea.vmem %s1000_s12, 512  ;;  %p1002_p0 = scmp.lt.s32.totalorder %s1309_s19, %s1000_s12 }
 0x270   : > { %p1003_p3 = scmp.lt.s32.totalorder %s1001_s20, %s995_s21 }
 0x272   : > { %557 = vrot.lane.b32.xlu1 %v541_v33, %s1109_s17  ;;  %p1004_p2 = por %p1003_p3, %p1002_p0 }
 0x274   : > { %p1005_p9 = pnand %p1004_p2, %p998_p10 }
 0x29b   : > { %506 = vxpose.xlu1.b32.start.end [1/1] (short) (narrow) %v438_v39, 32 }
 0x2e0   : > { %v566_v40 = vpop.permute.xlu0 %565  ;;  %v550_v41 = vpop.permute.xlu1 %549 }
 0x2e1   : > { %771 = vst.msk [vmem:[%s345_s16 + $0xc] sm:$0xf] %vm539_vm4, %v566_v40  ;;  %767 = vst.msk [vmem:[%s345_s16 + $0x4] sm:$0xf] %vm539_vm4, %v550_v41 }
 0x2e4   : > { %v558_v42 = vpop.permute.xlu1 %557 }
 0x2e5   : > { %769 = vst.msk [vmem:[%s345_s16 + $0x8] sm:$0xf] %vm539_vm4, %v558_v42 }
 0x2e6   : > { %1008 = shalt.err (!%p1005_p9)
}
 0x2e7   : > { %s1009_s16 = scalar_lea.hbm %s1317_s30, 256  ;;  %s1013_s22 = scalar_lea.hbm %s1410_s7, 512 }
 0x2e8   : > { %p1010_p12 = scmp.ne.s32.totalorder %s1317_s30, %s1009_s16  ;;  %p1014_p4 = scmp.lt.s32.totalorder %s1317_s30, %s1410_s7 }
 0x2e9   : > { %p1015_p6 = scmp.lt.s32.totalorder %s1013_s22, %s1009_s16 }
 0x2ea   : > { %p1011_p13 = pnand %p1010_p12, %p1431_p11 }
 0x2eb   : > { %p1016_p8 = por %p1015_p6, %p1014_p4 }
 0x2ec   : > { %p1012_p1 = pneg %p1011_p13 }
 0x2ee   : > { %p1017_p5 = pnand %p1016_p8, %p1012_p1 }
 0x2f0   : > { %1020 = shalt.err (!%p1017_p5)
}
 0x2f1   : > { %s1111_s21 = smov 64   ;;  %s1112_s23 = smov 4  }
 0x2f2   : > { %820 = dma.vmem_to_hbm [thread:$0]  (%p1431_p11), %s1309_s19, 256, %s1317_s30, %s576_s9, %s1111_s21, %s1111_s21, %s1112_s23  }
 0x2f3   : > { %s338_s12 = scalar_lea.vmem [#allocation10], %s754_s10  ;;  %s1358_s30 = scalar_lea.hbm %s1409_s6, %s781_s2 }
 0x2f4   : > { %s589_s20 = sshll.u32 %s338_s12, 4  ;;  %s571_s9 = scalar_lea.sflag [#allocation4], %s1281_s0  ;;  %s1351_s20 = int_to_ptr.vmem [resolvable:$true] %s589_s20 }
 0x2f5   : > { %s1021_s16 = scalar_lea.vmem %s1351_s20, 256  ;;  %s1113_s17 = smov [#allocation10]  }
 0x2f6   : > { %p1022_p7 = scmp.ne.s32.totalorder %s1351_s20, %s1021_s16  ;;  %s1025_s14 = sshll.u32 %s1113_s17, 4  ;;  %s1026_s14 = int_to_ptr.vmem [resolvable:$false] %s1025_s14 }
 0x2f7   : > { %s1027_s22 = scalar_lea.vmem %s1026_s14, 512  ;;  %p1028_p3 = scmp.lt.s32.totalorder %s1351_s20, %s1026_s14 }
 0x2f8   : > { %p1023_p10 = pnand %p1022_p7, %p1431_p11  ;;  %p1029_p2 = scmp.lt.s32.totalorder %s1027_s22, %s1021_s16 }
 0x2fa   : > { %p1024_p0 = pneg %p1023_p10  ;;  %p1030_p9 = por %p1029_p2, %p1028_p3 }
 0x2fc   : > { %p1031_p12 = pnand %p1030_p9, %p1024_p0 }
 0x317   : > { %v522_v43 = vpop.trf.xlu1 }
 0x318   : > { %v538_v44 = vpack.c.bf16 %v522_v43, %v522_v43 }
 0x31a   : > { %540 = vst.msk [vmem:[%s338_s12] sm:$0xf] %vm539_vm4, %v538_v44 }
 0x31b   : > { %v523_v45 = vpop.trf.xlu1 }
 0x31c   : > { %v543_v46 = vpack.c.bf16 %v523_v45, %v523_v45 }
 0x31e   : > { %765 = vst.msk [vmem:[%s338_s12 + $0x4] sm:$0xf] %vm539_vm4, %v543_v46 }
 0x31f   : > { %v524_v47 = vpop.trf.xlu1 }
 0x320   : > { %v554_v48 = vpack.c.bf16 %v524_v47, %v524_v47 }
 0x322   : > { %768 = vst.msk [vmem:[%s338_s12 + $0x8] sm:$0xf] %vm539_vm4, %v554_v48 }
 0x323   : > { %v525_v49 = vpop.trf.xlu1 }
 0x324   : > { %v562_v50 = vpack.c.bf16 %v525_v49, %v525_v49 }
 0x326   : > { %770 = vst.msk [vmem:[%s338_s12 + $0xc] sm:$0xf] %vm539_vm4, %v562_v50 }
 0x327   : > { %1034 = shalt.err (!%p1031_p12)
}
 0x328   : > { %s1035_s28 = scalar_lea.hbm %s1358_s30, 256  ;;  %s1039_s13 = scalar_lea.hbm %s1409_s6, 512 }
 0x329   : > { %p1036_p13 = scmp.ne.s32.totalorder %s1358_s30, %s1035_s28  ;;  %p1040_p6 = scmp.lt.s32.totalorder %s1358_s30, %s1409_s6 }
 0x32a   : > { %p1041_p8 = scmp.lt.s32.totalorder %s1039_s13, %s1035_s28 }
 0x32b   : > { %p1037_p1 = pnand %p1036_p13, %p1431_p11 }
 0x32c   : > { %p1042_p5 = por %p1041_p8, %p1040_p6 }
 0x32d   : > { %p1038_p4 = pneg %p1037_p1 }
 0x32f   : > { %p1043_p7 = pnand %p1042_p5, %p1038_p4 }
 0x331   : > { %1046 = shalt.err (!%p1043_p7)
}
 0x332   : > { %819 = dma.vmem_to_hbm [thread:$0]  (%p1431_p11), %s1351_s20, 256, %s1358_s30, %s571_s9, %s1111_s21, %s1111_s21, %s1112_s23  }
 0x333 PF: > { %s620_s10 = sand.u32 1, %s1085_s24   ;;  %p1432_p10 = scmp.ne.s32.totalorder %s1418_s8, 0 }
 0x334   : > { %p1433_p0 = scmp.ge.s32.totalorder %s1097_s27, 2  ;;  %s621_s19 = scalar_lea.sflag [#allocation4], %s620_s10 }
 0x336   : > { %p838_p3 = pnand %p1433_p0, %p1432_p10 }
 0x338   : > { %p839_p2 = pneg %p838_p3 }
 0x33a   : > { %1076 = dma.done.wait (%p839_p2), %s621_s19, 256  }
 0x33b   : > { %1078 = vsyncadd (%p839_p2), %s621_s19, 4294967040  ;;  %s630_s16 = scalar_lea.sflag [#allocation12], %s620_s10 }
 0x33c   : > { %1080 = dma.done.wait (%p839_p2), %s630_s16, 256  }
 0x33d   : > { %1082 = vsyncadd (%p839_p2), %s630_s16, 4294967040  ;;  %p26_p11 = scmp.ge.s32.totalorder %s1231_s11, 4   ;;  %s1434_s24 = smov %s1089_s25 }
 0x33e   : > { %s1435_s25 = smov %s1093_s26  ;;  %s1436_s26 = smov %s1241_s15 }
 0x33f   : > { %s1437_s27 = smov %s1231_s11  ;;  %28 = sbr.rel (!%p26_p11) target bundleno = 12 (0xc), region = 125 }
 0x344   :  { %635 = vsyncpa [#allocation3], 1 }
 0x345   :  { %637 = vsyncpa [#allocation3 + $0x1], 1 }
 0x346   :  { %638 = vsyncpa [#allocation8], 1 }
 0x347   :  { %639 = vsyncpa [#allocation4], 1 }
 0x348   :  { %641 = vsyncpa [#allocation4 + $0x1], 1 }
 0x349   :  { %642 = vsyncpa [#allocation12], 1 }
 0x34a   :  { %644 = vsyncpa [#allocation12 + $0x1], 1 }
 0x34b   :  { %645 = vsyncpa [#allocation5], 1 }
 0x34c   :  { %647 = vsyncpa [#allocation5 + $0x1], 1 }

</bundles_post_ra>
